<compile_context>
chip_gen: v6e
topology: v6e:2x2x1
jax: 0.10.0
libtpu: 0.0.40
codegen_flags: <defaults>
</compile_context>

<pallas_src>
import functools

import jax
import jax.numpy as jnp
from jax import lax
from jax.experimental import pallas as pl
from jax.experimental.pallas import tpu as pltpu

EPS = 1e-5
_LANE = 128


def _round_up(x, m):
    return ((x + m - 1) // m) * m


def _make_basic_block_kernel(N, H, W, Cin, Cp, G, compute_dtype):
    Hp, Wp = H + 2, W + 2
    NS = N * Hp * Wp                       # flattened padded spatial
    NSP = _round_up(NS, _LANE)             # lane-padded spatial (lane axis)
    M = _round_up(Wp + 1, _LANE)           # zero extension >= max |tap offset|
    E = M + NSP + M
    offsets = [(ky - 1) * Wp + (kx - 1) for ky in range(3) for kx in range(3)]
    inv_count = 1.0 / float(N * H * W)

    def kernel(xe_ref, w1_ref, w2_ref, g1_ref, b1_ref, g2_ref, b2_ref,
               mask_ref, out_ref, mid_ref):
        mask = mask_ref[...]               # (1, NSP), 1.0 at interior pixels

        def conv3x3(src_ref, w_ref):
            # Fused im2col: 9 static lane-offset windows of the zero-extended
            # source, stacked along the contraction axis -> one MXU dot with
            # K = 9*C and a lane-dense (G, NSP) f32 output.
            taps = [src_ref[:, M + d:M + d + NSP] for d in offsets]
            patches = jnp.concatenate(taps, axis=0).astype(compute_dtype)
            return jnp.dot(w_ref[...], patches,
                           preferred_element_type=jnp.float32)

        def bn_relu(acc, g_ref, b_ref, apply_mask):
            # Training-mode batch stats over the N*H*W interior pixels, folded
            # into a single per-channel scale/bias.
            mean = jnp.sum(acc * mask, axis=-1, keepdims=True) * inv_count
            cent = (acc - mean) * mask
            var = jnp.sum(cent * cent, axis=-1, keepdims=True) * inv_count
            scale = g_ref[...] * lax.rsqrt(var + EPS)
            bias = b_ref[...] - mean * scale
            y = jnp.maximum(acc * scale + bias, 0.0)
            # re-zero the halo only when the result feeds conv2 (acts as its
            # zero padding); the final output's halo lanes are discarded in
            # the wrapper, so skip the extra VPU multiply there.
            return y * mask if apply_mask else y

        # ---- conv1 -> bn1 -> relu ----
        y1 = bn_relu(conv3x3(xe_ref, w1_ref), g1_ref, b1_ref, True)   # (G, NSP)

        # Stage conv1's output once in a zero-extended scratch; only the two
        # 128-lane end strips are zeroed and every store is lane-aligned
        # (no full padded-buffer zero/store/reload).
        mid_ref[:, 0:M] = jnp.zeros((G, M), jnp.float32)
        mid_ref[:, M + NSP:E] = jnp.zeros((G, E - M - NSP), jnp.float32)
        mid_ref[:, M:M + NSP] = y1

        # ---- conv2 -> bn2 -> relu ----
        y2 = bn_relu(conv3x3(mid_ref, w2_ref), g2_ref, b2_ref, False)  # (G, NSP)

        # Fused torch.cat([x, out], dim=1): passthrough x channels plus the
        # new features in one lane-dense (multiple-of-128) output slab.
        out_ref[0:Cin, :] = xe_ref[0:Cin, M:M + NSP]
        out_ref[Cin:Cin + G, :] = y2

    return kernel


@functools.partial(jax.jit, static_argnames=("compute_dtype",))
def basic_block_forward(x_nchw, w1_t, w2_t, g1, b1, g2, b2, *,
                        compute_dtype=jnp.float32):
    """x_nchw: (N, Cin, H, W) PyTorch layout; w*_t in torch (Cout, Cin, 3, 3)."""
    N, Cin, H, W = x_nchw.shape
    G = w1_t.shape[0]
    Cp = _round_up(Cin, 8)                 # pad input channels to sublane tile
    Hp, Wp = H + 2, W + 2
    NS = N * Hp * Wp
    NSP = _round_up(NS, _LANE)
    M = _round_up(Wp + 1, _LANE)
    E = M + NSP + M

    # ---- layout plumbing only (tiny arrays, no compute) ----
    x_cn = jnp.transpose(x_nchw, (1, 0, 2, 3)).astype(jnp.float32)   # (Cin,N,H,W)
    x_cn = jnp.pad(x_cn, ((0, Cp - Cin), (0, 0), (1, 1), (1, 1)))    # (Cp,N,Hp,Wp)
    xe = jnp.pad(x_cn.reshape(Cp, NS), ((0, 0), (M, E - M - NS)))    # (Cp, E)

    # torch (Cout,Cin,3,3) -> (Cout, 9*C) with columns ordered (ky, kx, ci),
    # matching the kernel's tap-major patch rows.
    w1p = jnp.pad(w1_t.astype(jnp.float32), ((0, 0), (0, Cp - Cin), (0, 0), (0, 0)))
    w1m = jnp.transpose(w1p, (0, 2, 3, 1)).reshape(G, 9 * Cp).astype(compute_dtype)
    w2m = jnp.transpose(w2_t.astype(jnp.float32),
                        (0, 2, 3, 1)).reshape(G, 9 * G).astype(compute_dtype)

    # interior-pixel mask in the flattened, lane-padded layout
    mask = jnp.pad(jnp.ones((N, H, W), jnp.float32),
                   ((0, 0), (1, 1), (1, 1))).reshape(1, NS)
    mask = jnp.pad(mask, ((0, 0), (0, NSP - NS)))                    # (1, NSP)

    kernel = _make_basic_block_kernel(N, H, W, Cin, Cp, G, compute_dtype)
    vmem = pl.BlockSpec(memory_space=pltpu.MemorySpace.VMEM)

    out_flat = pl.pallas_call(
        kernel,
        out_shape=jax.ShapeDtypeStruct((Cin + G, NSP), jnp.float32),
        in_specs=[vmem] * 8,
        out_specs=vmem,
        scratch_shapes=[pltpu.VMEM((G, E), jnp.float32)],
    )(xe, w1m, w2m,
      g1.reshape(G, 1).astype(jnp.float32), b1.reshape(G, 1).astype(jnp.float32),
      g2.reshape(G, 1).astype(jnp.float32), b2.reshape(G, 1).astype(jnp.float32),
      mask)

    # back to NCHW: drop lane pad / reshape / slice interior / transpose
    out = out_flat[:, :NS].reshape(Cin + G, N, Hp, Wp)[:, :, 1:H + 1, 1:W + 1]
    return jnp.transpose(out, (1, 0, 2, 3))


def ref_forward(x_nchw, w1_t, w2_t, g1, b1, g2, b2):
    """Pure-JAX reference (lax.conv) for verification."""
    x = jnp.transpose(x_nchw, (0, 2, 3, 1)).astype(jnp.float32)
    dn = ("NHWC", "HWIO", "NHWC")
    w1 = jnp.transpose(w1_t, (2, 3, 1, 0))
    w2 = jnp.transpose(w2_t, (2, 3, 1, 0))

    def bn_relu(o, g, b):
        m = jnp.mean(o, axis=(0, 1, 2), keepdims=True)
        v = jnp.mean((o - m) ** 2, axis=(0, 1, 2), keepdims=True)
        return jnp.maximum((o - m) * lax.rsqrt(v + EPS) * g + b, 0.0)

    o = lax.conv_general_dilated(x, w1, (1, 1), "SAME", dimension_numbers=dn)
    o = bn_relu(o, g1, b1)
    o = lax.conv_general_dilated(o, w2, (1, 1), "SAME", dimension_numbers=dn)
    o = bn_relu(o, g2, b2)
    out = jnp.concatenate([x, o], axis=-1)
    return jnp.transpose(out, (0, 3, 1, 2))


if __name__ == "__main__":
    N, Cin, H, W = 2, 4, 16, 16
    G = 8  # growth_rate

    key = jax.random.PRNGKey(0)
    kx, kw1, kw2, kg1, kb1, kg2, kb2 = jax.random.split(key, 7)

    x = jax.random.normal(kx, (N, Cin, H, W), jnp.float32)
    # conv weights in torch layout (Cout, Cin, kH, kW), no bias
    w1 = 0.1 * jax.random.normal(kw1, (G, Cin, 3, 3), jnp.float32)
    w2 = 0.1 * jax.random.normal(kw2, (G, G, 3, 3), jnp.float32)
    # BN affine params (PyTorch init is ones/zeros; perturb to exercise math)
    g1 = 1.0 + 0.1 * jax.random.normal(kg1, (G,), jnp.float32)
    b1 = 0.1 * jax.random.normal(kb1, (G,), jnp.float32)
    g2 = 1.0 + 0.1 * jax.random.normal(kg2, (G,), jnp.float32)
    b2 = 0.1 * jax.random.normal(kb2, (G,), jnp.float32)

    ref = jax.block_until_ready(ref_forward(x, w1, w2, g1, b1, g2, b2))

    # f32 MXU path: tight check against the f32 reference.
    out = jax.block_until_ready(
        basic_block_forward(x, w1, w2, g1, b1, g2, b2))
    assert out.shape == (N, Cin + G, H, W), out.shape
    assert jnp.allclose(out, ref, atol=1e-3, rtol=1e-3), \
        float(jnp.max(jnp.abs(out - ref)))

    # bf16 MXU path (v6e/v7x fast path): f32 accumulation + BN, looser check.
    out_bf16 = jax.block_until_ready(
        basic_block_forward(x, w1, w2, g1, b1, g2, b2,
                            compute_dtype=jnp.bfloat16))
    assert out_bf16.shape == (N, Cin + G, H, W), out_bf16.shape
    assert jnp.allclose(out_bf16, ref, atol=1e-1, rtol=1e-1), \
        float(jnp.max(jnp.abs(out_bf16 - ref)))

    print("KERNEL_OK")
</pallas_src>

<mosaic_0001>
module attributes {stable_mosaic.version = 11 : i64} {
  func.func @kernel(%arg0: memref<8x1024xf32, #tpu.memory_space<vmem>>, %arg1: memref<8x72xf32, #tpu.memory_space<vmem>>, %arg2: memref<8x72xf32, #tpu.memory_space<vmem>>, %arg3: memref<8x1xf32, #tpu.memory_space<vmem>>, %arg4: memref<8x1xf32, #tpu.memory_space<vmem>>, %arg5: memref<8x1xf32, #tpu.memory_space<vmem>>, %arg6: memref<8x1xf32, #tpu.memory_space<vmem>>, %arg7: memref<1x768xf32, #tpu.memory_space<vmem>>, %arg8: memref<12x768xf32, #tpu.memory_space<vmem>>, %arg9: memref<8x1024xf32, #tpu.memory_space<vmem>>) attributes {dimension_semantics = [], scalar_prefetch = 0 : i64, scratch_operands = 1 : i64, tpu.core_type = #tpu.core_type<tc>} {
    %c0 = arith.constant 0 : index
    %c0_0 = arith.constant 0 : index
    %0 = vector.load %arg7[%c0, %c0_0] : memref<1x768xf32, #tpu.memory_space<vmem>>, vector<1x768xf32>
    %c0_1 = arith.constant 0 : index
    %c109 = arith.constant 109 : index
    %1 = vector.load %arg0[%c0_1, %c109] : memref<8x1024xf32, #tpu.memory_space<vmem>>, vector<8x768xf32>
    %c0_2 = arith.constant 0 : index
    %c110 = arith.constant 110 : index
    %2 = vector.load %arg0[%c0_2, %c110] : memref<8x1024xf32, #tpu.memory_space<vmem>>, vector<8x768xf32>
    %c0_3 = arith.constant 0 : index
    %c111 = arith.constant 111 : index
    %3 = vector.load %arg0[%c0_3, %c111] : memref<8x1024xf32, #tpu.memory_space<vmem>>, vector<8x768xf32>
    %c0_4 = arith.constant 0 : index
    %c127 = arith.constant 127 : index
    %4 = vector.load %arg0[%c0_4, %c127] : memref<8x1024xf32, #tpu.memory_space<vmem>>, vector<8x768xf32>
    %c0_5 = arith.constant 0 : index
    %c128 = arith.constant 128 : index
    %5 = vector.load %arg0[%c0_5, %c128] : memref<8x1024xf32, #tpu.memory_space<vmem>>, vector<8x768xf32>
    %c0_6 = arith.constant 0 : index
    %c129 = arith.constant 129 : index
    %6 = vector.load %arg0[%c0_6, %c129] : memref<8x1024xf32, #tpu.memory_space<vmem>>, vector<8x768xf32>
    %c0_7 = arith.constant 0 : index
    %c145 = arith.constant 145 : index
    %7 = vector.load %arg0[%c0_7, %c145] : memref<8x1024xf32, #tpu.memory_space<vmem>>, vector<8x768xf32>
    %c0_8 = arith.constant 0 : index
    %c146 = arith.constant 146 : index
    %8 = vector.load %arg0[%c0_8, %c146] : memref<8x1024xf32, #tpu.memory_space<vmem>>, vector<8x768xf32>
    %c0_9 = arith.constant 0 : index
    %c147 = arith.constant 147 : index
    %9 = vector.load %arg0[%c0_9, %c147] : memref<8x1024xf32, #tpu.memory_space<vmem>>, vector<8x768xf32>
    %10 = tpu.concatenate %1, %2, %3, %4, %5, %6, %7, %8, %9 in 0 : vector<8x768xf32>, vector<8x768xf32>, vector<8x768xf32>, vector<8x768xf32>, vector<8x768xf32>, vector<8x768xf32>, vector<8x768xf32>, vector<8x768xf32>, vector<8x768xf32> -> vector<72x768xf32>
    %c0_10 = arith.constant 0 : index
    %c0_11 = arith.constant 0 : index
    %11 = vector.load %arg1[%c0_10, %c0_11] : memref<8x72xf32, #tpu.memory_space<vmem>>, vector<8x72xf32>
    %cst = arith.constant dense<0.000000e+00> : vector<8x768xf32>
    %12 = tpu.matmul %11, %10, %cst {dimension_numbers = #tpu.dot_dimension_numbers<[1], [0], [0], [1], [0, 0, 1, 1], [], []>} : vector<8x72xf32>, vector<72x768xf32>, vector<8x768xf32> -> vector<8x768xf32>
    %13 = vector.broadcast %0 : vector<1x768xf32> to vector<8x768xf32>
    %14 = arith.mulf %12, %13 : vector<8x768xf32>
    %cst_12 = arith.constant dense<0.000000e+00> : vector<8xf32>
    %15 = vector.multi_reduction <add>, %14, %cst_12 [1] : vector<8x768xf32> to vector<8xf32>
    %16 = vector.shape_cast %15 : vector<8xf32> to vector<8x1xf32>
    %cst_13 = arith.constant 0.001953125 : f32
    %17 = vector.broadcast %cst_13 : f32 to vector<8x1xf32>
    %18 = arith.mulf %16, %17 : vector<8x1xf32>
    %19 = vector.broadcast %18 : vector<8x1xf32> to vector<8x768xf32>
    %20 = arith.subf %12, %19 : vector<8x768xf32>
    %21 = vector.broadcast %0 : vector<1x768xf32> to vector<8x768xf32>
    %22 = arith.mulf %20, %21 : vector<8x768xf32>
    %23 = arith.mulf %22, %22 : vector<8x768xf32>
    %cst_14 = arith.constant dense<0.000000e+00> : vector<8xf32>
    %24 = vector.multi_reduction <add>, %23, %cst_14 [1] : vector<8x768xf32> to vector<8xf32>
    %25 = vector.shape_cast %24 : vector<8xf32> to vector<8x1xf32>
    %cst_15 = arith.constant 0.001953125 : f32
    %26 = vector.broadcast %cst_15 : f32 to vector<8x1xf32>
    %27 = arith.mulf %25, %26 : vector<8x1xf32>
    %c0_16 = arith.constant 0 : index
    %c0_17 = arith.constant 0 : index
    %28 = vector.load %arg3[%c0_16, %c0_17] : memref<8x1xf32, #tpu.memory_space<vmem>>, vector<8x1xf32>
    %cst_18 = arith.constant 9.99999974E-6 : f32
    %29 = vector.broadcast %cst_18 : f32 to vector<8x1xf32>
    %30 = arith.addf %27, %29 : vector<8x1xf32>
    %31 = math.rsqrt %30 : vector<8x1xf32>
    %32 = arith.mulf %28, %31 : vector<8x1xf32>
    %c0_19 = arith.constant 0 : index
    %c0_20 = arith.constant 0 : index
    %33 = vector.load %arg4[%c0_19, %c0_20] : memref<8x1xf32, #tpu.memory_space<vmem>>, vector<8x1xf32>
    %34 = arith.mulf %18, %32 : vector<8x1xf32>
    %35 = arith.subf %33, %34 : vector<8x1xf32>
    %36 = vector.broadcast %32 : vector<8x1xf32> to vector<8x768xf32>
    %37 = arith.mulf %12, %36 : vector<8x768xf32>
    %38 = vector.broadcast %35 : vector<8x1xf32> to vector<8x768xf32>
    %39 = arith.addf %37, %38 : vector<8x768xf32>
    %cst_21 = arith.constant 0.000000e+00 : f32
    %40 = vector.broadcast %cst_21 : f32 to vector<8x768xf32>
    %41 = arith.maximumf %39, %40 : vector<8x768xf32>
    %42 = vector.broadcast %0 : vector<1x768xf32> to vector<8x768xf32>
    %43 = arith.mulf %41, %42 : vector<8x768xf32>
    %cst_22 = arith.constant 0.000000e+00 : f32
    %44 = vector.broadcast %cst_22 : f32 to vector<8x128xf32>
    %c0_23 = arith.constant 0 : index
    %c0_24 = arith.constant 0 : index
    %45 = vector.load %arg9[%c0_23, %c0_24] : memref<8x1024xf32, #tpu.memory_space<vmem>>, vector<8x128xf32>
    tpu.vector_store %arg9[%c0_23, %c0_24], %44 {strides = array<i32>} : memref<8x1024xf32, #tpu.memory_space<vmem>>, vector<8x128xf32>,
    %cst_25 = arith.constant 0.000000e+00 : f32
    %46 = vector.broadcast %cst_25 : f32 to vector<8x128xf32>
    %c0_26 = arith.constant 0 : index
    %c896 = arith.constant 896 : index
    %47 = vector.load %arg9[%c0_26, %c896] : memref<8x1024xf32, #tpu.memory_space<vmem>>, vector<8x128xf32>
    tpu.vector_store %arg9[%c0_26, %c896], %46 {strides = array<i32>} : memref<8x1024xf32, #tpu.memory_space<vmem>>, vector<8x128xf32>,
    %c0_27 = arith.constant 0 : index
    %c128_28 = arith.constant 128 : index
    %48 = vector.load %arg9[%c0_27, %c128_28] : memref<8x1024xf32, #tpu.memory_space<vmem>>, vector<8x768xf32>
    tpu.vector_store %arg9[%c0_27, %c128_28], %43 {strides = array<i32>} : memref<8x1024xf32, #tpu.memory_space<vmem>>, vector<8x768xf32>,
    %c0_29 = arith.constant 0 : index
    %c109_30 = arith.constant 109 : index
    %49 = vector.load %arg9[%c0_29, %c109_30] : memref<8x1024xf32, #tpu.memory_space<vmem>>, vector<8x768xf32>
    %c0_31 = arith.constant 0 : index
    %c110_32 = arith.constant 110 : index
    %50 = vector.load %arg9[%c0_31, %c110_32] : memref<8x1024xf32, #tpu.memory_space<vmem>>, vector<8x768xf32>
    %c0_33 = arith.constant 0 : index
    %c111_34 = arith.constant 111 : index
    %51 = vector.load %arg9[%c0_33, %c111_34] : memref<8x1024xf32, #tpu.memory_space<vmem>>, vector<8x768xf32>
    %c0_35 = arith.constant 0 : index
    %c127_36 = arith.constant 127 : index
    %52 = vector.load %arg9[%c0_35, %c127_36] : memref<8x1024xf32, #tpu.memory_space<vmem>>, vector<8x768xf32>
    %c0_37 = arith.constant 0 : index
    %c128_38 = arith.constant 128 : index
    %53 = vector.load %arg9[%c0_37, %c128_38] : memref<8x1024xf32, #tpu.memory_space<vmem>>, vector<8x768xf32>
    %c0_39 = arith.constant 0 : index
    %c129_40 = arith.constant 129 : index
    %54 = vector.load %arg9[%c0_39, %c129_40] : memref<8x1024xf32, #tpu.memory_space<vmem>>, vector<8x768xf32>
    %c0_41 = arith.constant 0 : index
    %c145_42 = arith.constant 145 : index
    %55 = vector.load %arg9[%c0_41, %c145_42] : memref<8x1024xf32, #tpu.memory_space<vmem>>, vector<8x768xf32>
    %c0_43 = arith.constant 0 : index
    %c146_44 = arith.constant 146 : index
    %56 = vector.load %arg9[%c0_43, %c146_44] : memref<8x1024xf32, #tpu.memory_space<vmem>>, vector<8x768xf32>
    %c0_45 = arith.constant 0 : index
    %c147_46 = arith.constant 147 : index
    %57 = vector.load %arg9[%c0_45, %c147_46] : memref<8x1024xf32, #tpu.memory_space<vmem>>, vector<8x768xf32>
    %58 = tpu.concatenate %49, %50, %51, %52, %53, %54, %55, %56, %57 in 0 : vector<8x768xf32>, vector<8x768xf32>, vector<8x768xf32>, vector<8x768xf32>, vector<8x768xf32>, vector<8x768xf32>, vector<8x768xf32>, vector<8x768xf32>, vector<8x768xf32> -> vector<72x768xf32>
    %c0_47 = arith.constant 0 : index
    %c0_48 = arith.constant 0 : index
    %59 = vector.load %arg2[%c0_47, %c0_48] : memref<8x72xf32, #tpu.memory_space<vmem>>, vector<8x72xf32>
    %cst_49 = arith.constant dense<0.000000e+00> : vector<8x768xf32>
    %60 = tpu.matmul %59, %58, %cst_49 {dimension_numbers = #tpu.dot_dimension_numbers<[1], [0], [0], [1], [0, 0, 1, 1], [], []>} : vector<8x72xf32>, vector<72x768xf32>, vector<8x768xf32> -> vector<8x768xf32>
    %61 = vector.broadcast %0 : vector<1x768xf32> to vector<8x768xf32>
    %62 = arith.mulf %60, %61 : vector<8x768xf32>
    %cst_50 = arith.constant dense<0.000000e+00> : vector<8xf32>
    %63 = vector.multi_reduction <add>, %62, %cst_50 [1] : vector<8x768xf32> to vector<8xf32>
    %64 = vector.shape_cast %63 : vector<8xf32> to vector<8x1xf32>
    %cst_51 = arith.constant 0.001953125 : f32
    %65 = vector.broadcast %cst_51 : f32 to vector<8x1xf32>
    %66 = arith.mulf %64, %65 : vector<8x1xf32>
    %67 = vector.broadcast %66 : vector<8x1xf32> to vector<8x768xf32>
    %68 = arith.subf %60, %67 : vector<8x768xf32>
    %69 = vector.broadcast %0 : vector<1x768xf32> to vector<8x768xf32>
    %70 = arith.mulf %68, %69 : vector<8x768xf32>
    %71 = arith.mulf %70, %70 : vector<8x768xf32>
    %cst_52 = arith.constant dense<0.000000e+00> : vector<8xf32>
    %72 = vector.multi_reduction <add>, %71, %cst_52 [1] : vector<8x768xf32> to vector<8xf32>
    %73 = vector.shape_cast %72 : vector<8xf32> to vector<8x1xf32>
    %cst_53 = arith.constant 0.001953125 : f32
    %74 = vector.broadcast %cst_53 : f32 to vector<8x1xf32>
    %75 = arith.mulf %73, %74 : vector<8x1xf32>
    %c0_54 = arith.constant 0 : index
    %c0_55 = arith.constant 0 : index
    %76 = vector.load %arg5[%c0_54, %c0_55] : memref<8x1xf32, #tpu.memory_space<vmem>>, vector<8x1xf32>
    %cst_56 = arith.constant 9.99999974E-6 : f32
    %77 = vector.broadcast %cst_56 : f32 to vector<8x1xf32>
    %78 = arith.addf %75, %77 : vector<8x1xf32>
    %79 = math.rsqrt %78 : vector<8x1xf32>
    %80 = arith.mulf %76, %79 : vector<8x1xf32>
    %c0_57 = arith.constant 0 : index
    %c0_58 = arith.constant 0 : index
    %81 = vector.load %arg6[%c0_57, %c0_58] : memref<8x1xf32, #tpu.memory_space<vmem>>, vector<8x1xf32>
    %82 = arith.mulf %66, %80 : vector<8x1xf32>
    %83 = arith.subf %81, %82 : vector<8x1xf32>
    %84 = vector.broadcast %80 : vector<8x1xf32> to vector<8x768xf32>
    %85 = arith.mulf %60, %84 : vector<8x768xf32>
    %86 = vector.broadcast %83 : vector<8x1xf32> to vector<8x768xf32>
    %87 = arith.addf %85, %86 : vector<8x768xf32>
    %cst_59 = arith.constant 0.000000e+00 : f32
    %88 = vector.broadcast %cst_59 : f32 to vector<8x768xf32>
    %89 = arith.maximumf %87, %88 : vector<8x768xf32>
    %c0_60 = arith.constant 0 : index
    %c128_61 = arith.constant 128 : index
    %90 = vector.load %arg0[%c0_60, %c128_61] : memref<8x1024xf32, #tpu.memory_space<vmem>>, vector<4x768xf32>
    %c0_62 = arith.constant 0 : index
    %c0_63 = arith.constant 0 : index
    %91 = vector.load %arg8[%c0_62, %c0_63] : memref<12x768xf32, #tpu.memory_space<vmem>>, vector<4x768xf32>
    tpu.vector_store %arg8[%c0_62, %c0_63], %90 {strides = array<i32>} : memref<12x768xf32, #tpu.memory_space<vmem>>, vector<4x768xf32>,
    %c4 = arith.constant 4 : index
    %c0_64 = arith.constant 0 : index
    %92 = vector.load %arg8[%c4, %c0_64] : memref<12x768xf32, #tpu.memory_space<vmem>>, vector<8x768xf32>
    tpu.vector_store %arg8[%c4, %c0_64], %89 {strides = array<i32>} : memref<12x768xf32, #tpu.memory_space<vmem>>, vector<8x768xf32>,
    return
  }
}

</mosaic_0001>

<bundles_post_ra>
// kernel: basic_block_forward.1
= control target key start
LH: loop header
LB: loop body
LE: loop exit
PB: predicated region body
PF: predicated region fallthrough
CT: control target
= control target key end

     0   :  { %s1576_s9 = smov 90   ;;  %s1577_s12 = smov 91   ;;  %vm216_vm0 = vcmask 736256   ;;  %vm195_vm1 = vcmask 744448   ;;  %vm174_vm2 = vcmask 752640   ;;  %vm153_vm3 = vcmask 883712   ;;  %s2698_s0 = inlined_call_operand.vmem [shape: f32[8,1024], index: 0, kind: input, shape index: {}]   ;;  %s2699_s1 = inlined_call_operand.vmem [shape: f32[8,72], index: 1, kind: input, shape index: {}]   ;;  %s2700_s7 = inlined_call_operand.vmem [shape: f32[1,768], index: 7, kind: input, shape index: {}]   ;;  %s2701_s3 = inlined_call_operand.vmem [shape: f32[8,1], index: 3, kind: input, shape index: {}]   ;;  %s2702_s4 = inlined_call_operand.vmem [shape: f32[8,1], index: 4, kind: input, shape index: {}]   ;;  %s2703_s2 = inlined_call_operand.vmem [shape: f32[8,72], index: 2, kind: input, shape index: {}]   ;;  %s2704_s5 = inlined_call_operand.vmem [shape: f32[8,1], index: 5, kind: input, shape index: {}]   ;;  %s2705_s6 = inlined_call_operand.vmem [shape: f32[8,1], index: 6, kind: input, shape index: {}]   ;;  %s2706_s8 = inlined_call_operand.vmem [shape: f32[12,768], index: 8, kind: output, shape index: {}]  }
   0x1   :  { %v1635_v0 = vld [vmem:[%s2698_s0 + $0x18] sm:$0xff]  ;;  %v1640_v1 = vld [vmem:[%s2698_s0 + $0x8] sm:$0xff]  ;;  %v1649_v2 = vld [vmem:[%s2698_s0 + $0x10] sm:$0xff]  ;;  %s1578_s13 = smov 92   ;;  %s1579_s14 = smov 108   ;;  %vm126_vm4 = vcmask 891904  }
   0x2   :  { %206 = vrot.lane.b32.xlu1 %v1635_v0, %s1576_s9  ;;  %202 = vrot.lane.b32.xlu0 %v1640_v1, %s1576_s9  ;;  %s1580_s15 = smov 109   ;;  %s1581_s16 = smov 110   ;;  %v1686_v3 = vld [vmem:[%s2698_s0] sm:$0xff]  ;;  %v1707_v4 = vld [vmem:[%s2698_s0 + $0x28] sm:$0xff]  ;;  %vm107_vm5 = vcmask 900096   ;;  %vm86_vm6 = vcmask 1031168  }
   0x3   :  { %s1582_s19 = smov 126   ;;  %s1583_s20 = smov 127   ;;  %v1712_v5 = vld [vmem:[%s2698_s0 + $0x20] sm:$0xff]  ;;  %v1729_v6 = vld [vmem:[%s2698_s0 + $0x30] sm:$0xff]  ;;  %v43_v7 = vld [vmem:[%s2698_s0 + $0x38] sm:$0xff]  ;;  %vm65_vm7 = vcmask 1039360  }
   0x4   :  { %s1584_s29 = smov 19   ;;  %v1585_v62 = vmov 0.0   ;;  %vm350_vm8 = vcmask 154624   ;;  %vm459_vm9 = vcmask 588800  }
   0x5   :  { %527 = vmatprep.mubr.f32.mxu0 %v1585_v62  ;;  %598 = vmatprep.mubr.f32.mxu1 %v1585_v62 }
   0x6   :  { %181 = vrot.lane.b32.xlu1 %v1640_v1, %s1577_s12  ;;  %204 = vrot.lane.b32.xlu0 %v1649_v2, %s1576_s9 }
   0xa   :  { %185 = vrot.lane.b32.xlu1 %v1635_v0, %s1577_s12  ;;  %183 = vrot.lane.b32.xlu0 %v1649_v2, %s1577_s12 }
   0xe   :  { %162 = vrot.lane.b32.xlu1 %v1649_v2, %s1578_s13  ;;  %160 = vrot.lane.b32.xlu0 %v1640_v1, %s1578_s13 }
  0x12   :  { %139 = vrot.lane.b32.xlu1 %v1640_v1, %s1579_s14  ;;  %164 = vrot.lane.b32.xlu0 %v1635_v0, %s1578_s13 }
  0x16   :  { %143 = vrot.lane.b32.xlu1 %v1635_v0, %s1579_s14  ;;  %141 = vrot.lane.b32.xlu0 %v1649_v2, %s1579_s14 }
  0x1a   :  { %116 = vrot.lane.b32.xlu1 %v1649_v2, %s1580_s15  ;;  %114 = vrot.lane.b32.xlu0 %v1640_v1, %s1580_s15 }
  0x1e   :  { %95 = vrot.lane.b32.xlu1 %v1640_v1, %s1581_s16  ;;  %118 = vrot.lane.b32.xlu0 %v1635_v0, %s1580_s15 }
  0x22   :  { %99 = vrot.lane.b32.xlu1 %v1635_v0, %s1581_s16  ;;  %97 = vrot.lane.b32.xlu0 %v1649_v2, %s1581_s16 }
  0x26   :  { %74 = vrot.lane.b32.xlu1 %v1640_v1, %s1582_s19  ;;  %93 = vrot.lane.b32.xlu0 %v1686_v3, %s1581_s16 }
  0x2a   :  { %78 = vrot.lane.b32.xlu1 %v1635_v0, %s1582_s19  ;;  %76 = vrot.lane.b32.xlu0 %v1649_v2, %s1582_s19 }
  0x2e   :  { %53 = vrot.lane.b32.xlu1 %v1640_v1, %s1583_s20  ;;  %72 = vrot.lane.b32.xlu0 %v1686_v3, %s1582_s19 }
  0x32   :  { %57 = vrot.lane.b32.xlu1 %v1635_v0, %s1583_s20  ;;  %55 = vrot.lane.b32.xlu0 %v1649_v2, %s1583_s20 }
  0x36   :  { %210 = vrot.lane.b32.xlu1 %v1707_v4, %s1576_s9  ;;  %208 = vrot.lane.b32.xlu0 %v1712_v5, %s1576_s9 }
  0x3a   :  { %187 = vrot.lane.b32.xlu1 %v1712_v5, %s1577_s12  ;;  %51 = vrot.lane.b32.xlu0 %v1686_v3, %s1583_s20 }
  0x3e   :  { %166 = vrot.lane.b32.xlu1 %v1712_v5, %s1578_s13  ;;  %189 = vrot.lane.b32.xlu0 %v1707_v4, %s1577_s12 }
  0x42   :  { %212 = vrot.lane.b32.xlu1 %v1729_v6, %s1576_s9  ;;  %168 = vrot.lane.b32.xlu0 %v1707_v4, %s1578_s13 }
  0x46   :  { %145 = vrot.lane.b32.xlu1 %v1712_v5, %s1579_s14  ;;  %214 = vrot.lane.b32.xlu0 %v43_v7, %s1576_s9 }
  0x4a   :  { %191 = vrot.lane.b32.xlu1 %v1729_v6, %s1577_s12  ;;  %147 = vrot.lane.b32.xlu0 %v1707_v4, %s1579_s14 }
  0x4e   :  { %120 = vrot.lane.b32.xlu1 %v1712_v5, %s1580_s15  ;;  %193 = vrot.lane.b32.xlu0 %v43_v7, %s1577_s12 }
  0x52   :  { %170 = vrot.lane.b32.xlu1 %v1729_v6, %s1578_s13  ;;  %122 = vrot.lane.b32.xlu0 %v1707_v4, %s1580_s15 }
  0x56   :  { %101 = vrot.lane.b32.xlu1 %v1712_v5, %s1581_s16  ;;  %172 = vrot.lane.b32.xlu0 %v43_v7, %s1578_s13 }
  0x5a   :  { %149 = vrot.lane.b32.xlu1 %v1729_v6, %s1579_s14  ;;  %103 = vrot.lane.b32.xlu0 %v1707_v4, %s1581_s16 }
  0x5e   :  { %80 = vrot.lane.b32.xlu1 %v1712_v5, %s1582_s19  ;;  %151 = vrot.lane.b32.xlu0 %v43_v7, %s1579_s14 }
  0x62   :  { %124 = vrot.lane.b32.xlu1 %v1729_v6, %s1580_s15  ;;  %82 = vrot.lane.b32.xlu0 %v1707_v4, %s1582_s19 }
  0x66   :  { %61 = vrot.lane.b32.xlu1 %v1707_v4, %s1583_s20  ;;  %59 = vrot.lane.b32.xlu0 %v1712_v5, %s1583_s20 }
  0x6a   :  { %84 = vrot.lane.b32.xlu1 %v1729_v6, %s1582_s19  ;;  %105 = vrot.lane.b32.xlu0 %v1729_v6, %s1581_s16 }
  0x6e   :  { %63 = vrot.lane.b32.xlu0 %v1729_v6, %s1583_s20 }
  0x74   :  { %v1776_v8 = vpop.permute.xlu1 %206  ;;  %v203_v9 = vpop.permute.xlu0 %202 }
  0x75   :  { %336 = vrot.lane.b32.xlu1 %v203_v9, %s1584_s29 }
  0x78   :  { %v182_v10 = vpop.permute.xlu1 %181  ;;  %v205_v11 = vpop.permute.xlu0 %204 }
  0x79   :  { %v217_v12 = vsel %vm216_vm0, %v203_v9, %v205_v11  ;;  %v218_v13 = vsel %vm216_vm0, %v205_v11, %v1776_v8 }
  0x7a   :  { %338 = vrot.lane.b32.xlu1 %v217_v12, %s1584_s29  ;;  %340 = vrot.lane.b32.xlu0 %v218_v13, %s1584_s29 }
  0x7c   :  { %v1784_v14 = vpop.permute.xlu1 %185  ;;  %v184_v15 = vpop.permute.xlu0 %183 }
  0x7d   :  { %v197_v16 = vsel %vm195_vm1, %v184_v15, %v1784_v14  ;;  %v196_v17 = vsel %vm195_vm1, %v182_v10, %v184_v15 }
  0x7e   :  { %326 = vrot.lane.b32.xlu1 %v197_v16, %s1584_s29  ;;  %324 = vrot.lane.b32.xlu0 %v196_v17, %s1584_s29 }
  0x80   :  { %v163_v18 = vpop.permute.xlu1 %162  ;;  %v161_v19 = vpop.permute.xlu0 %160 }
  0x81   :  { %v175_v20 = vsel %vm174_vm2, %v161_v19, %v163_v18 }
  0x82   :  { %310 = vrot.lane.b32.xlu1 %v175_v20, %s1584_s29  ;;  %322 = vrot.lane.b32.xlu0 %v182_v10, %s1584_s29 }
  0x84   :  { %v140_v21 = vpop.permute.xlu1 %139  ;;  %v1794_v22 = vpop.permute.xlu0 %164 }
  0x85   :  { %v176_v23 = vsel %vm174_vm2, %v163_v18, %v1794_v22 }
  0x86   :  { %308 = vrot.lane.b32.xlu1 %v161_v19, %s1584_s29  ;;  %312 = vrot.lane.b32.xlu0 %v176_v23, %s1584_s29 }
  0x88   :  { %v1800_v24 = vpop.permute.xlu1 %143  ;;  %v142_v25 = vpop.permute.xlu0 %141 }
  0x89   :  { %v155_v26 = vsel %vm153_vm3, %v142_v25, %v1800_v24  ;;  %v154_v27 = vsel %vm153_vm3, %v140_v21, %v142_v25 }
  0x8a   :  { %298 = vrot.lane.b32.xlu1 %v155_v26, %s1584_s29  ;;  %296 = vrot.lane.b32.xlu0 %v154_v27, %s1584_s29 }
  0x8c   :  { %v117_v28 = vpop.permute.xlu1 %116  ;;  %v115_v29 = vpop.permute.xlu0 %114 }
  0x8d   :  { %v127_v30 = vsel %vm126_vm4, %v115_v29, %v117_v28 }
  0x8e   :  { %282 = vrot.lane.b32.xlu1 %v127_v30, %s1584_s29  ;;  %294 = vrot.lane.b32.xlu0 %v140_v21, %s1584_s29 }
  0x90   :  { %v96_v31 = vpop.permute.xlu1 %95  ;;  %v1810_v32 = vpop.permute.xlu0 %118 }
  0x91   :  { %v128_v33 = vsel %vm126_vm4, %v117_v28, %v1810_v32 }
  0x92   :  { %280 = vrot.lane.b32.xlu1 %v115_v29, %s1584_s29  ;;  %284 = vrot.lane.b32.xlu0 %v128_v33, %s1584_s29 }
  0x94   :  { %v1816_v34 = vpop.permute.xlu1 %99  ;;  %v98_v35 = vpop.permute.xlu0 %97 }
  0x95   :  { %v110_v36 = vsel %vm107_vm5, %v98_v35, %v1816_v34  ;;  %v109_v37 = vsel %vm107_vm5, %v96_v31, %v98_v35 }
  0x96   :  { %270 = vrot.lane.b32.xlu1 %v110_v36, %s1584_s29  ;;  %268 = vrot.lane.b32.xlu0 %v109_v37, %s1584_s29 }
  0x98   :  { %v75_v38 = vpop.permute.xlu1 %74  ;;  %v94_v39 = vpop.permute.xlu0 %93 }
  0x99   :  { %v108_v40 = vsel %vm107_vm5, %v94_v39, %v96_v31 }
  0x9a   :  { %266 = vrot.lane.b32.xlu0 %v108_v40, %s1584_s29 }
  0x9c   :  { %v1825_v41 = vpop.permute.xlu1 %78  ;;  %v77_v42 = vpop.permute.xlu0 %76 }
  0x9d   :  { %v89_v43 = vsel %vm86_vm6, %v77_v42, %v1825_v41  ;;  %v88_v44 = vsel %vm86_vm6, %v75_v38, %v77_v42 }
  0x9e   :  { %256 = vrot.lane.b32.xlu0 %v89_v43, %s1584_s29  ;;  %254 = vrot.lane.b32.xlu1 %v88_v44, %s1584_s29 }
  0xa0   :  { %v54_v45 = vpop.permute.xlu1 %53  ;;  %v73_v46 = vpop.permute.xlu0 %72 }
  0xa1   :  { %v87_v47 = vsel %vm86_vm6, %v73_v46, %v75_v38 }
  0xa2   :  { %252 = vrot.lane.b32.xlu1 %v87_v47, %s1584_s29 }
  0xa4   :  { %v1834_v48 = vpop.permute.xlu1 %57  ;;  %v56_v49 = vpop.permute.xlu0 %55 }
  0xa5   :  { %v68_v50 = vsel %vm65_vm7, %v56_v49, %v1834_v48  ;;  %v67_v51 = vsel %vm65_vm7, %v54_v45, %v56_v49 }
  0xa6   :  { %242 = vrot.lane.b32.xlu1 %v68_v50, %s1584_s29  ;;  %240 = vrot.lane.b32.xlu0 %v67_v51, %s1584_s29 }
  0xa8   :  { %v211_v52 = vpop.permute.xlu1 %210  ;;  %v209_v53 = vpop.permute.xlu0 %208 }
  0xa9   :  { %v220_v54 = vsel %vm216_vm0, %v209_v53, %v211_v52  ;;  %v219_v55 = vsel %vm216_vm0, %v1776_v8, %v209_v53 }
  0xaa   :  { %344 = vrot.lane.b32.xlu1 %v220_v54, %s1584_s29  ;;  %342 = vrot.lane.b32.xlu0 %v219_v55, %s1584_s29 }
  0xac   :  { %v188_v56 = vpop.permute.xlu1 %187  ;;  %v52_v57 = vpop.permute.xlu0 %51 }
  0xad   :  { %v66_v58 = vsel %vm65_vm7, %v52_v57, %v54_v45  ;;  %v198_v61 = vsel %vm195_vm1, %v1784_v14, %v188_v56 }
  0xae   :  { %226 = vrot.lane.b32.xlu1 %v1640_v1, %s1584_s29  ;;  %238 = vrot.lane.b32.xlu0 %v66_v58, %s1584_s29 }
  0xb0   :  { %v167_v59 = vpop.permute.xlu1 %166  ;;  %v190_v60 = vpop.permute.xlu0 %189 }
  0xb1   :  { %v199_v1 = vsel %vm195_vm1, %v188_v56, %v190_v60  ;;  %v177_v11 = vsel %vm174_vm2, %v1794_v22, %v167_v59 }
  0xb2   :  { %328 = vrot.lane.b32.xlu1 %v198_v61, %s1584_s29  ;;  %228 = vrot.lane.b32.xlu0 %v1649_v2, %s1584_s29 }
  0xb4   :  { %v213_v63 = vpop.permute.xlu1 %212  ;;  %v169_v7 = vpop.permute.xlu0 %168 }
  0xb5   :  { %v178_v8 = vsel %vm174_vm2, %v167_v59, %v169_v7  ;;  %v221_v14 = vsel %vm216_vm0, %v211_v52, %v213_v63 }
  0xb6   :  { %224 = vrot.lane.b32.xlu1 %v1686_v3, %s1584_s29  ;;  %330 = vrot.lane.b32.xlu0 %v199_v1, %s1584_s29 }
  0xb8   :  { %v146_v9 = vpop.permute.xlu1 %145  ;;  %v215_v10 = vpop.permute.xlu0 %214 }
  0xb9   :  { %v222_v2 = vsel %vm216_vm0, %v213_v63, %v215_v10  ;;  %v156_v17 = vsel %vm153_vm3, %v1800_v24, %v146_v9 }
  0xba   :  { %314 = vrot.lane.b32.xlu0 %v177_v11, %s1584_s29  ;;  %316 = vrot.lane.b32.xlu1 %v178_v8, %s1584_s29 }
  0xbc   :  { %v192_v12 = vpop.permute.xlu1 %191  ;;  %v148_v13 = vpop.permute.xlu0 %147 }
  0xbd   :  { %v157_v3 = vsel %vm153_vm3, %v146_v9, %v148_v13  ;;  %v200_v21 = vsel %vm195_vm1, %v190_v60, %v192_v12 }
  0xbe   :  { %346 = vrot.lane.b32.xlu0 %v221_v14, %s1584_s29  ;;  %348 = vrot.lane.b32.xlu1 %v222_v2, %s1584_s29 }
  0xc0   :  { %v121_v15 = vpop.permute.xlu1 %120  ;;  %v194_v16 = vpop.permute.xlu0 %193 }
  0xc1   :  { %v201_v18 = vsel %vm195_vm1, %v192_v12, %v194_v16  ;;  %v129_v24 = vsel %vm126_vm4, %v1810_v32, %v121_v15 }
  0xc2   :  { %300 = vrot.lane.b32.xlu0 %v156_v17, %s1584_s29  ;;  %302 = vrot.lane.b32.xlu1 %v157_v3, %s1584_s29 }
  0xc4   :  { %v171_v19 = vpop.permute.xlu1 %170  ;;  %v123_v20 = vpop.permute.xlu0 %122 }
  0xc5   :  { %v130_v22 = vsel %vm126_vm4, %v121_v15, %v123_v20  ;;  %v179_v29 = vsel %vm174_vm2, %v169_v7, %v171_v19 }
  0xc6   :  { %332 = vrot.lane.b32.xlu0 %v200_v21, %s1584_s29  ;;  %334 = vrot.lane.b32.xlu1 %v201_v18, %s1584_s29 }
  0xc8   :  { %v102_v23 = vpop.permute.xlu1 %101  ;;  %v173_v25 = vpop.permute.xlu0 %172 }
  0xc9   :  { %v180_v26 = vsel %vm174_vm2, %v171_v19, %v173_v25  ;;  %v111_v32 = vsel %vm107_vm5, %v1816_v34, %v102_v23 }
  0xca   :  { %286 = vrot.lane.b32.xlu0 %v129_v24, %s1584_s29  ;;  %288 = vrot.lane.b32.xlu1 %v130_v22, %s1584_s29 }
  0xcc   :  { %v150_v27 = vpop.permute.xlu1 %149  ;;  %v104_v28 = vpop.permute.xlu0 %103 }
  0xcd   :  { %v112_v30 = vsel %vm107_vm5, %v102_v23, %v104_v28  ;;  %v158_v36 = vsel %vm153_vm3, %v148_v13, %v150_v27 }
  0xce   :  { %318 = vrot.lane.b32.xlu0 %v179_v29, %s1584_s29  ;;  %320 = vrot.lane.b32.xlu1 %v180_v26, %s1584_s29 }
  0xd0   :  { %v152_v31 = vpop.permute.xlu0 %151  ;;  %v81_v33 = vpop.permute.xlu1 %80 }
  0xd1   :  { %v159_v35 = vsel %vm153_vm3, %v150_v27, %v152_v31  ;;  %v90_v40 = vsel %vm86_vm6, %v1825_v41, %v81_v33 }
  0xd2   :  { %272 = vrot.lane.b32.xlu0 %v111_v32, %s1584_s29  ;;  %274 = vrot.lane.b32.xlu1 %v112_v30, %s1584_s29 }
  0xd4   :  { %v83_v37 = vpop.permute.xlu0 %82  ;;  %v125_v38 = vpop.permute.xlu1 %124 }
  0xd5   :  { %v91_v39 = vsel %vm86_vm6, %v81_v33, %v83_v37  ;;  %v131_v43 = vsel %vm126_vm4, %v123_v20, %v125_v38 }
  0xd6   :  { %304 = vrot.lane.b32.xlu0 %v158_v36, %s1584_s29  ;;  %306 = vrot.lane.b32.xlu1 %v159_v35, %s1584_s29 }
  0xd8   :  { %v60_v34 = vpop.permute.xlu0 %59  ;;  %v62_v42 = vpop.permute.xlu1 %61 }
  0xd9   :  { %v70_v44 = vsel %vm65_vm7, %v60_v34, %v62_v42  ;;  %v69_v45 = vsel %vm65_vm7, %v1834_v48, %v60_v34 }
  0xda   :  { %258 = vrot.lane.b32.xlu0 %v90_v40, %s1584_s29  ;;  %260 = vrot.lane.b32.xlu1 %v91_v39, %s1584_s29  ;;  %v1979_v39 = vld [vmem:[%s2699_s1] sm:$0xff] }
  0xdc   :  { %v106_v46 = vpop.permute.xlu0 %105  ;;  %v85_v41 = vpop.permute.xlu1 %84 }
  0xdd   :  { %v113_v47 = vsel %vm107_vm5, %v104_v28, %v106_v46  ;;  %v92_v52 = vsel %vm86_vm6, %v83_v37, %v85_v41 }
  0xde   :  { %290 = vrot.lane.b32.xlu0 %v131_v43, %s1584_s29  ;;  %292 = vrot.lane.b32.xlu1 %v125_v38, %s1584_s29 }
  0xe0   :  { %v64_v50 = vpop.permute.xlu0 %63 }
  0xe1   :  { %v71_v55 = vsel %vm65_vm7, %v62_v42, %v64_v50 }
  0xe2   :  { %246 = vrot.lane.b32.xlu1 %v70_v44, %s1584_s29  ;;  %244 = vrot.lane.b32.xlu0 %v69_v45, %s1584_s29 }
  0xe6   :  { %276 = vrot.lane.b32.xlu0 %v113_v47, %s1584_s29  ;;  %278 = vrot.lane.b32.xlu1 %v106_v46, %s1584_s29 }
  0xe7   :  { %v337_v49 = vpop.permute.xlu1 %336 }
  0xea   :  { %230 = vrot.lane.b32.xlu0 %v1635_v0, %s1584_s29  ;;  %232 = vrot.lane.b32.xlu1 %v1712_v5, %s1584_s29 }
  0xec   :  { %v339_v48 = vpop.permute.xlu1 %338  ;;  %v1917_v51 = vpop.permute.xlu0 %340 }
  0xed   :  { %v400_v53 = vsel %vm350_vm8, %v339_v48, %v1917_v51  ;;  %v399_v54 = vsel %vm350_vm8, %v337_v49, %v339_v48 }
  0xee   :  { %262 = vrot.lane.b32.xlu0 %v92_v52, %s1584_s29  ;;  %264 = vrot.lane.b32.xlu1 %v85_v41, %s1584_s29 }
  0xef   :  { %477 = vmatprep.subr.mxu0 %v400_v53 }
  0xf0   :  { %478 = vmatpush1.msra.mxu0 %v399_v54  ;;  %v1925_v0 = vpop.permute.xlu1 %326  ;;  %v325_v5 = vpop.permute.xlu0 %324 }
  0xf1   :  { %v394_v56 = vsel %vm350_vm8, %v325_v5, %v1925_v0 }
  0xf2   :  { %248 = vrot.lane.b32.xlu0 %v71_v55, %s1584_s29  ;;  %250 = vrot.lane.b32.xlu1 %v64_v50, %s1584_s29 }
  0xf3   :  { %479 = vmatprep.subr.mxu0 %v394_v56 }
  0xf4   :  { %v311_v57 = vpop.permute.xlu1 %310  ;;  %v323_v58 = vpop.permute.xlu0 %322 }
  0xf5   :  { %v393_v59 = vsel %vm350_vm8, %v323_v58, %v325_v5 }
  0xf6   :  { %234 = vrot.lane.b32.xlu0 %v1707_v4, %s1584_s29  ;;  %236 = vrot.lane.b32.xlu1 %v1729_v6, %s1584_s29 }
  0xf7   :  { %480 = vmatpush1.msra.mxu0 %v393_v59 }
  0xf8   :  { %v309_v60 = vpop.permute.xlu1 %308  ;;  %v1937_v61 = vpop.permute.xlu0 %312 }
  0xf9   :  { %v388_v63 = vsel %vm350_vm8, %v311_v57, %v1937_v61  ;;  %v387_v7 = vsel %vm350_vm8, %v309_v60, %v311_v57 }
  0xfa   :  { %481 = vmatprep.subr.mxu0 %v388_v63  ;;  %982 = vrot.lane.b32.xlu1 %v1585_v62, %s1584_s29 }
  0xfb   :  { %482 = vmatpush1.msra.mxu0 %v387_v7 }
  0xfc   :  { %v1944_v1 = vpop.permute.xlu1 %298  ;;  %v297_v4 = vpop.permute.xlu0 %296 }
  0xfd   :  { %v382_v6 = vsel %vm350_vm8, %v297_v4, %v1944_v1 }
  0xfe   :  { %483 = vmatprep.subr.mxu0 %v382_v6 }
 0x100   :  { %v283_v8 = vpop.permute.xlu1 %282  ;;  %v295_v9 = vpop.permute.xlu0 %294 }
 0x101   :  { %v381_v10 = vsel %vm350_vm8, %v295_v9, %v297_v4 }
 0x102   :  { %484 = vmatpush1.msra.mxu0 %v381_v10 }
 0x104   :  { %v281_v11 = vpop.permute.xlu1 %280  ;;  %v1949_v2 = vpop.permute.xlu0 %284 }
 0x105   :  { %v376_v12 = vsel %vm350_vm8, %v283_v8, %v1949_v2  ;;  %v375_v13 = vsel %vm350_vm8, %v281_v11, %v283_v8 }
 0x106   :  { %485 = vmatprep.subr.mxu0 %v376_v12 }
 0x107   :  { %486 = vmatpush1.msra.mxu0 %v375_v13 }
 0x108   :  { %v1954_v14 = vpop.permute.xlu1 %270  ;;  %v269_v3 = vpop.permute.xlu0 %268 }
 0x109   :  { %v370_v15 = vsel %vm350_vm8, %v269_v3, %v1954_v14 }
 0x10a   :  { %487 = vmatprep.subr.mxu0 %v370_v15 }
 0x10c   :  { %v267_v16 = vpop.permute.xlu0 %266 }
 0x10d   :  { %v369_v17 = vsel %vm350_vm8, %v267_v16, %v269_v3 }
 0x10e   :  { %488 = vmatpush1.msra.mxu0 %v369_v17 }
 0x110   :  { %v255_v18 = vpop.permute.xlu1 %254  ;;  %v1959_v19 = vpop.permute.xlu0 %256 }
 0x111   :  { %v364_v20 = vsel %vm350_vm8, %v255_v18, %v1959_v19 }
 0x112   :  { %489 = vmatprep.subr.mxu0 %v364_v20 }
 0x114   :  { %v253_v21 = vpop.permute.xlu1 %252 }
 0x115   :  { %v363_v22 = vsel %vm350_vm8, %v253_v21, %v255_v18 }
 0x116   :  { %490 = vmatpush1.msra.mxu0 %v363_v22 }
 0x118   :  { %v1964_v23 = vpop.permute.xlu1 %242  ;;  %v241_v25 = vpop.permute.xlu0 %240 }
 0x119   :  { %v358_v24 = vsel %vm350_vm8, %v241_v25, %v1964_v23 }
 0x11a   :  { %491 = vmatprep.subr.mxu0 %v358_v24 }
 0x11c   :  { %v345_v26 = vpop.permute.xlu1 %344  ;;  %v343_v27 = vpop.permute.xlu0 %342 }
 0x11d   :  { %v402_v28 = vsel %vm350_vm8, %v343_v27, %v345_v26  ;;  %v401_v29 = vsel %vm350_vm8, %v1917_v51, %v343_v27 }
 0x11e   :  { %548 = vmatprep.subr.mxu1 %v402_v28 }
 0x11f   :  { %549 = vmatpush1.msra.mxu1 %v401_v29 }
 0x120   :  { %v227_v30 = vpop.permute.xlu1 %226  ;;  %v239_v31 = vpop.permute.xlu0 %238 }
 0x121   :  { %v357_v33 = vsel %vm350_vm8, %v239_v31, %v241_v25 }
 0x122   :  { %492 = vmatpush1.msra.mxu0 %v357_v33 }
 0x124   :  { %v329_v32 = vpop.permute.xlu1 %328  ;;  %v1972_v35 = vpop.permute.xlu0 %228 }
 0x125   :  { %v352_v36 = vsel %vm350_vm8, %v227_v30, %v1972_v35  ;;  %v395_v42 = vsel %vm350_vm8, %v1925_v0, %v329_v32 }
 0x126   :  { %493 = vmatprep.subr.mxu0 %v352_v36 }
 0x128   :  { %v225_v37 = vpop.permute.xlu1 %224  ;;  %v331_v38 = vpop.permute.xlu0 %330 }
 0x129   :  { %v351_v40 = vsel %vm350_vm8, %v225_v37, %v227_v30  ;;  %v396_v34 = vsel %vm350_vm8, %v329_v32, %v331_v38 }
 0x12a   :  { %494 = vmatpush1.msra.mxu0 %v351_v40  ;;  %550 = vmatprep.subr.mxu1 %v396_v34 }
 0x12b   :  { %551 = vmatpush1.msra.mxu1 %v395_v42  ;;  %1553 = vmatmul.mubr.msk.f32.vlgmr.msra.gmra.mxu0 %vm459_vm9, %v1979_v39 }
 0x12c   :  { %v317_v43 = vpop.permute.xlu1 %316  ;;  %v315_v44 = vpop.permute.xlu0 %314  ;;  %669 = vmatprep.mubr.f32.mxu0 %v1585_v62 }
 0x12d   :  { %v390_v45 = vsel %vm350_vm8, %v315_v44, %v317_v43  ;;  %v389_v46 = vsel %vm350_vm8, %v1937_v61, %v315_v44 }
 0x12e   :  { %552 = vmatprep.subr.mxu1 %v390_v45  ;;  %v677_v45 = vlaneseq }
 0x12f   :  { %553 = vmatpush1.msra.mxu1 %v389_v46 }
 0x130   :  { %v349_v41 = vpop.permute.xlu1 %348  ;;  %v347_v47 = vpop.permute.xlu0 %346  ;;  %v678_v46 = vshrl.u32 %v677_v45, 7 }
 0x131   :  { %v404_v49 = vsel %vm350_vm8, %v347_v47, %v349_v41  ;;  %v403_v50 = vsel %vm350_vm8, %v345_v26, %v347_v47 }
 0x132   :  { %619 = vmatprep.subr.mxu0 %v404_v49  ;;  %v679_v41 = vsub.s32 0, %v678_v46  ;;  %v683_v47 = vsub.s32 1, %v678_v46  ;;  %v29_v49 = vld [vmem:[%s2700_s7] sm:$0x3f] }
 0x133   :  { %620 = vmatpush1.msra.mxu0 %v403_v50 }
 0x134   :  { %v303_v48 = vpop.permute.xlu1 %302  ;;  %v301_v51 = vpop.permute.xlu0 %300 }
 0x135   :  { %v384_v52 = vsel %vm350_vm8, %v301_v51, %v303_v48  ;;  %v383_v53 = vsel %vm350_vm8, %v1944_v1, %v301_v51  ;;  %v2038_v51 = vrot.slane %v29_v49, %v679_v41  ;;  %v751_v41 = vld [vmem:[%s2702_s4] sm:$0xff] }
 0x136   :  { %554 = vmatprep.subr.mxu1 %v384_v52  ;;  %v2040_v52 = vrot.slane %v29_v49, %v683_v47 }
 0x137   :  { %555 = vmatpush1.msra.mxu1 %v383_v53 }
 0x138   :  { %v335_v54 = vpop.permute.xlu1 %334  ;;  %v333_v0 = vpop.permute.xlu0 %332 }
 0x139   :  { %v398_v5 = vsel %vm350_vm8, %v333_v0, %v335_v54  ;;  %v397_v55 = vsel %vm350_vm8, %v331_v38, %v333_v0  ;;  %v691_v54 = vsub.s32 3, %v678_v46 }
 0x13a   :  { %621 = vmatprep.subr.mxu0 %v398_v5 }
 0x13b   :  { %622 = vmatpush1.msra.mxu0 %v397_v55 }
 0x13c   :  { %v289_v56 = vpop.permute.xlu1 %288  ;;  %v287_v57 = vpop.permute.xlu0 %286 }
 0x13d   :  { %v378_v58 = vsel %vm350_vm8, %v287_v57, %v289_v56  ;;  %v377_v59 = vsel %vm350_vm8, %v1949_v2, %v287_v57  ;;  %v2054_v57 = vrot.slane %v29_v49, %v691_v54 }
 0x13e   :  { %556 = vmatprep.subr.mxu1 %v378_v58  ;;  %v695_v58 = vsub.s32 4, %v678_v46 }
 0x13f   :  { %557 = vmatpush1.msra.mxu1 %v377_v59 }
 0x140   :  { %v321_v60 = vpop.permute.xlu1 %320  ;;  %v319_v61 = vpop.permute.xlu0 %318 }
 0x141   :  { %v392_v63 = vsel %vm350_vm8, %v319_v61, %v321_v60  ;;  %v391_v7 = vsel %vm350_vm8, %v317_v43, %v319_v61  ;;  %v699_v61 = vsub.s32 5, %v678_v46 }
 0x142   :  { %623 = vmatprep.subr.mxu0 %v392_v63 }
 0x143   :  { %624 = vmatpush1.msra.mxu0 %v391_v7 }
 0x144   :  { %v275_v1 = vpop.permute.xlu1 %274  ;;  %v273_v4 = vpop.permute.xlu0 %272 }
 0x145   :  { %v372_v6 = vsel %vm350_vm8, %v273_v4, %v275_v1  ;;  %v371_v8 = vsel %vm350_vm8, %v1954_v14, %v273_v4  ;;  %v2062_v4 = vrot.slane %v29_v49, %v699_v61 }
 0x146   :  { %558 = vmatprep.subr.mxu1 %v372_v6 }
 0x147   :  { %559 = vmatpush1.msra.mxu1 %v371_v8 }
 0x148   :  { %v307_v9 = vpop.permute.xlu1 %306  ;;  %v305_v10 = vpop.permute.xlu0 %304 }
 0x149   :  { %v386_v11 = vsel %vm350_vm8, %v305_v10, %v307_v9  ;;  %v385_v2 = vsel %vm350_vm8, %v303_v48, %v305_v10  ;;  %v687_v48 = vsub.s32 2, %v678_v46 }
 0x14a   :  { %625 = vmatprep.subr.mxu0 %v386_v11 }
 0x14b   :  { %626 = vmatpush1.msra.mxu0 %v385_v2 }
 0x14c   :  { %v261_v12 = vpop.permute.xlu1 %260  ;;  %v259_v13 = vpop.permute.xlu0 %258 }
 0x14d   :  { %v366_v3 = vsel %vm350_vm8, %v259_v13, %v261_v12  ;;  %v365_v15 = vsel %vm350_vm8, %v1959_v19, %v259_v13 }
 0x14e   :  { %560 = vmatprep.subr.mxu1 %v366_v3 }
 0x14f   :  { %561 = vmatpush1.msra.mxu1 %v365_v15 }
 0x150   :  { %v293_v14 = vpop.permute.xlu1 %292  ;;  %v291_v16 = vpop.permute.xlu0 %290 }
 0x151   :  { %v380_v17 = vsel %vm350_vm8, %v291_v16, %v293_v14  ;;  %v379_v18 = vsel %vm350_vm8, %v289_v56, %v291_v16 }
 0x152   :  { %627 = vmatprep.subr.mxu0 %v380_v17 }
 0x153   :  { %628 = vmatpush1.msra.mxu0 %v379_v18 }
 0x154   :  { %v247_v20 = vpop.permute.xlu1 %246  ;;  %v245_v21 = vpop.permute.xlu0 %244 }
 0x155   :  { %v360_v22 = vsel %vm350_vm8, %v245_v21, %v247_v20  ;;  %v359_v25 = vsel %vm350_vm8, %v1964_v23, %v245_v21 }
 0x156   :  { %562 = vmatprep.subr.mxu1 %v360_v22 }
 0x157   :  { %563 = vmatpush1.msra.mxu1 %v359_v25 }
 0x158   :  { %v279_v19 = vpop.permute.xlu1 %278  ;;  %v277_v24 = vpop.permute.xlu0 %276 }
 0x159   :  { %v374_v26 = vsel %vm350_vm8, %v277_v24, %v279_v19  ;;  %v373_v27 = vsel %vm350_vm8, %v275_v1, %v277_v24  ;;  %v2060_v1 = vrot.slane %v29_v49, %v695_v58 }
 0x15a   :  { %629 = vmatprep.subr.mxu0 %v374_v26 }
 0x15b   :  { %630 = vmatpush1.msra.mxu0 %v373_v27 }
 0x15c   :  { %v233_v28 = vpop.permute.xlu1 %232  ;;  %v231_v29 = vpop.permute.xlu0 %230 }
 0x15d   :  { %v354_v30 = vsel %vm350_vm8, %v231_v29, %v233_v28  ;;  %v353_v31 = vsel %vm350_vm8, %v1972_v35, %v231_v29 }
 0x15e   :  { %564 = vmatprep.subr.mxu1 %v354_v30 }
 0x15f   :  { %565 = vmatpush1.msra.mxu1 %v353_v31 }
 0x160   :  { %v265_v23 = vpop.permute.xlu1 %264  ;;  %1554 = vmatmul.mubr.msk.f32.vlgmr.msra.gmra.mxu1 %vm459_vm9, %v1979_v39  ;;  %v263_v33 = vpop.permute.xlu0 %262 }
 0x161   :  { %v368_v32 = vsel %vm350_vm8, %v263_v33, %v265_v23  ;;  %v367_v36 = vsel %vm350_vm8, %v261_v12, %v263_v33  ;;  %1283 = vmatprep.mubr.f32.mxu1 %v1585_v62 }
 0x162   :  { %631 = vmatprep.subr.mxu0 %v368_v32 }
 0x163   :  { %632 = vmatpush1.msra.mxu0 %v367_v36 }
 0x164   :  { %v251_v37 = vpop.permute.xlu1 %250  ;;  %v249_v38 = vpop.permute.xlu0 %248 }
 0x165   :  { %v362_v40 = vsel %vm350_vm8, %v249_v38, %v251_v37  ;;  %v361_v35 = vsel %vm350_vm8, %v247_v20, %v249_v38 }
 0x166   :  { %633 = vmatprep.subr.mxu0 %v362_v40  ;;  %v1586_v40 = vmov 0  }
 0x167   :  { %634 = vmatpush1.msra.mxu0 %v361_v35  ;;  %1570 = vset.pattern.permute.xlu0 %v1586_v40 }
 0x168   :  { %v237_v34 = vpop.permute.xlu1 %236  ;;  %v235_v42 = vpop.permute.xlu0 %234  ;;  %1571 = vset.pattern.permute.xlu1 %v1586_v40 }
 0x169   :  { %v356_v43 = vsel %vm350_vm8, %v235_v42, %v237_v34  ;;  %v355_v44 = vsel %vm350_vm8, %v233_v28, %v235_v42 }
 0x16a   :  { %635 = vmatprep.subr.mxu0 %v356_v43 }
 0x16b   :  { %636 = vmatpush1.msra.mxu0 %v355_v44  ;;  %v747_v44 = vld [vmem:[%s2701_s3] sm:$0xff] }
 0x16c   :  { %1555 = vmatmul.mubr.msk.f32.vlgmr.msra.gmra.mxu0 %vm459_vm9, %v1979_v39  ;;  %v2044_v39 = vrot.slane %v29_v49, %v687_v48  ;;  %v2098_v35 = vpop.permute.xlu1 %982 }
 0x16d   :  { %1354 = vmatprep.mubr.f32.mxu0 %v1585_v62 }
 0x1eb   :  { %v2036_v50 = vpop.f32.mrf.mxu0 }
 0x1ec   :  { %v707_v5 = vmul.f32 %v2038_v51, %v2036_v50 }
 0x1ed   :  { %v2042_v53 = vpop.f32.mrf.mxu0 }
 0x1ee   :  { %v708_v55 = vmul.f32 %v2040_v52, %v2042_v53 }
 0x1f0   :  { %v713_v60 = vadd.f32 %v708_v55, %v707_v5 }
 0x220   :  { %v2046_v0 = vpop.f32.mrf.mxu1 }
 0x221   :  { %v709_v56 = vmul.f32 %v2044_v39, %v2046_v0 }
 0x222   :  { %v2056_v59 = vpop.f32.mrf.mxu1 }
 0x223   :  { %v714_v63 = vadd.f32 %v713_v60, %v709_v56  ;;  %v710_v7 = vmul.f32 %v2054_v57, %v2056_v59 }
 0x225   :  { %v715_v8 = vadd.f32 %v714_v63, %v710_v7 }
 0x22c   :  { %v2064_v6 = vpop.f32.mrf.mxu0 }
 0x22d   :  { %v711_v9 = vmul.f32 %v2060_v1, %v2064_v6 }
 0x22e   :  { %v2068_v10 = vpop.f32.mrf.mxu0 }
 0x22f   :  { %v716_v11 = vadd.f32 %v715_v8, %v711_v9  ;;  %v712_v2 = vmul.f32 %v2062_v4, %v2068_v10 }
 0x231   :  { %v717_v12 = vadd.f32 %v716_v11, %v712_v2 }
 0x233   :  { %718 = vadd.xlane.f32.xlu0 %v717_v12 }
 0x249   :  { %857 = vrot.lane.b32.xlu0 %v1585_v62, %s1581_s16 }
 0x24d   :  { %837 = vrot.lane.b32.xlu0 %v1585_v62, %s1582_s19 }
 0x251   :  { %817 = vrot.lane.b32.xlu0 %v1585_v62, %s1583_s20 }
 0x255   :  { %973 = vrot.lane.b32.xlu0 %v1585_v62, %s1576_s9 }
 0x259   :  { %953 = vrot.lane.b32.xlu0 %v1585_v62, %s1577_s12 }
 0x25d   :  { %933 = vrot.lane.b32.xlu0 %v1585_v62, %s1578_s13 }
 0x261   :  { %913 = vrot.lane.b32.xlu0 %v1585_v62, %s1579_s14 }
 0x2bc   :  { %v719_v13 = vpop.xlane.xlu0 %718 }
 0x2bd   :  { %v720_v3 = vmul.f32 0.001953125, %v719_v13 }
 0x2bf   :  { %v721_v15 = vsub.f32 %v2036_v50, %v720_v3  ;;  %v722_v14 = vsub.f32 %v2042_v53, %v720_v3  ;;  %v723_v16 = vsub.f32 %v2046_v0, %v720_v3  ;;  %v724_v17 = vsub.f32 %v2056_v59, %v720_v3 }
 0x2c0   :  { %v725_v18 = vsub.f32 %v2064_v6, %v720_v3  ;;  %v726_v25 = vsub.f32 %v2068_v10, %v720_v3  ;;  %v2106_v48 = vpop.permute.xlu0 %857 }
 0x2c1   :  { %v727_v20 = vmul.f32 %v721_v15, %v2038_v51  ;;  %v728_v21 = vmul.f32 %v722_v14, %v2040_v52  ;;  %v729_v22 = vmul.f32 %v723_v16, %v2044_v39  ;;  %v730_v19 = vmul.f32 %v724_v17, %v2054_v57 }
 0x2c2   :  { %v731_v27 = vmul.f32 %v725_v18, %v2060_v1  ;;  %v732_v30 = vmul.f32 %v726_v25, %v2062_v4 }
 0x2c3   :  { %v733_v24 = vmul.f32 %v727_v20, %v727_v20  ;;  %v734_v26 = vmul.f32 %v728_v21, %v728_v21  ;;  %v735_v28 = vmul.f32 %v729_v22, %v729_v22  ;;  %v736_v31 = vmul.f32 %v730_v19, %v730_v19 }
 0x2c4   :  { %v737_v33 = vmul.f32 %v731_v27, %v731_v27  ;;  %v738_v36 = vmul.f32 %v732_v30, %v732_v30  ;;  %v2108_v54 = vpop.permute.xlu0 %837 }
 0x2c5   :  { %v739_v29 = vadd.f32 %v734_v26, %v733_v24 }
 0x2c7   :  { %v740_v23 = vadd.f32 %v739_v29, %v735_v28 }
 0x2c8   :  { %v2110_v5 = vpop.permute.xlu0 %817 }
 0x2c9   :  { %v741_v32 = vadd.f32 %v740_v23, %v736_v31 }
 0x2cb   :  { %v742_v37 = vadd.f32 %v741_v32, %v737_v33 }
 0x2cc   :  { %v2112_v55 = vpop.permute.xlu0 %973 }
 0x2cd   :  { %v743_v38 = vadd.f32 %v742_v37, %v738_v36 }
 0x2cf   :  { %744 = vadd.xlane.f32.xlu1 %v743_v38 }
 0x2d0   :  { %v2114_v56 = vpop.permute.xlu0 %953 }
 0x2d4   :  { %v2116_v58 = vpop.permute.xlu0 %933 }
 0x2d8   :  { %v2118_v60 = vpop.permute.xlu0 %913 }
 0x358   :  { %v745_v34 = vpop.xlane.xlu1 %744 }
 0x359   :  { %v746_v42 = vmul.f32 0.001953125, %v745_v34 }
 0x35b   :  { %v748_v43 = vadd.f32 1e-05, %v746_v42 }
 0x35d   :  { %1572 = vrsqrt.f32 %v748_v43 }
 0x36a   :  { %v1573_v45 = vpop.eup %1572 }
 0x36b   :  { %v750_v46 = vmul.f32 %v1573_v45, %v747_v44 }
 0x36d   :  { %756 = vperm.xlu0 %1570, %v750_v46   ;;  %v752_v47 = vmul.f32 %v750_v46, %v720_v3 }
 0x36f   :  { %v753_v49 = vsub.f32 %v751_v41, %v752_v47 }
 0x371   :  { %767 = vperm.xlu1 %1571, %v753_v49  }
 0x3e8   :  { %v757_v61 = vpop.permute.xlu0 %756 }
 0x3e9   :  { %v759_v63 = vmul.f32 %v757_v61, %v2036_v50  ;;  %v760_v7 = vmul.f32 %v757_v61, %v2042_v53  ;;  %v761_v8 = vmul.f32 %v757_v61, %v2046_v0  ;;  %v762_v0 = vmul.f32 %v757_v61, %v2056_v59 }
 0x3ea   :  { %v763_v17 = vmul.f32 %v757_v61, %v2064_v6  ;;  %v764_v22 = vmul.f32 %v757_v61, %v2068_v10 }
 0x3ec   :  { %v768_v9 = vpop.permute.xlu1 %767 }
 0x3ed   :  { %v770_v11 = vadd.f32 %v768_v9, %v759_v63  ;;  %v771_v2 = vadd.f32 %v768_v9, %v760_v7  ;;  %v772_v12 = vadd.f32 %v768_v9, %v761_v8  ;;  %v773_v16 = vadd.f32 %v768_v9, %v762_v0 }
 0x3ee   :  { %v774_v18 = vadd.f32 %v768_v9, %v763_v17  ;;  %v775_v25 = vadd.f32 %v768_v9, %v764_v22 }
 0x3ef   :  { %v776_v13 = vmax.f32 %v770_v11, 0.0  ;;  %v777_v3 = vmax.f32 %v771_v2, 0.0  ;;  %v778_v15 = vmax.f32 %v772_v12, 0.0  ;;  %v779_v20 = vmax.f32 %v773_v16, 0.0 }
 0x3f0   :  { %v780_v21 = vmax.f32 %v774_v18, 0.0  ;;  %v781_v19 = vmax.f32 %v775_v25, 0.0 }
 0x3f1   :  { %v2124_v14 = vmul.f32 %v776_v13, %v2038_v51  ;;  %v783_v50 = vmul.f32 %v777_v3, %v2040_v52  ;;  %v784_v53 = vmul.f32 %v778_v15, %v2044_v39  ;;  %v785_v59 = vmul.f32 %v779_v20, %v2054_v57 }
 0x3f2   :  { %v2155_v6 = vmul.f32 %v780_v21, %v2060_v1  ;;  %v2182_v24 = vmul.f32 %v781_v19, %v2062_v4 }
 0x3f3   :  { %921 = vrot.lane.b32.xlu0 %v2124_v14, %s1578_s13  ;;  %961 = vrot.lane.b32.xlu1 %v2124_v14, %s1576_s9 }
 0x3f7   :  { %925 = vrot.lane.b32.xlu0 %v784_v53, %s1578_s13  ;;  %963 = vrot.lane.b32.xlu1 %v783_v50, %s1576_s9 }
 0x3fb   :  { %903 = vrot.lane.b32.xlu0 %v783_v50, %s1579_s14  ;;  %965 = vrot.lane.b32.xlu1 %v784_v53, %s1576_s9 }
 0x3ff   :  { %877 = vrot.lane.b32.xlu0 %v2124_v14, %s1580_s15  ;;  %941 = vrot.lane.b32.xlu1 %v2124_v14, %s1577_s12 }
 0x403   :  { %881 = vrot.lane.b32.xlu0 %v784_v53, %s1580_s15  ;;  %943 = vrot.lane.b32.xlu1 %v783_v50, %s1577_s12 }
 0x407   :  { %861 = vrot.lane.b32.xlu0 %v783_v50, %s1581_s16  ;;  %945 = vrot.lane.b32.xlu1 %v784_v53, %s1577_s12 }
 0x40b   :  { %841 = vrot.lane.b32.xlu0 %v783_v50, %s1582_s19  ;;  %923 = vrot.lane.b32.xlu1 %v783_v50, %s1578_s13 }
 0x40f   :  { %821 = vrot.lane.b32.xlu0 %v783_v50, %s1583_s20  ;;  %901 = vrot.lane.b32.xlu1 %v2124_v14, %s1579_s14 }
 0x413   :  { %967 = vrot.lane.b32.xlu0 %v785_v59, %s1576_s9  ;;  %905 = vrot.lane.b32.xlu1 %v784_v53, %s1579_s14 }
 0x417   :  { %949 = vrot.lane.b32.xlu0 %v2155_v6, %s1577_s12  ;;  %879 = vrot.lane.b32.xlu1 %v783_v50, %s1580_s15 }
 0x41b   :  { %929 = vrot.lane.b32.xlu0 %v2155_v6, %s1578_s13  ;;  %859 = vrot.lane.b32.xlu1 %v2124_v14, %s1581_s16 }
 0x41f   :  { %909 = vrot.lane.b32.xlu0 %v2155_v6, %s1579_s14  ;;  %863 = vrot.lane.b32.xlu1 %v784_v53, %s1581_s16 }
 0x423   :  { %885 = vrot.lane.b32.xlu0 %v2155_v6, %s1580_s15  ;;  %839 = vrot.lane.b32.xlu1 %v2124_v14, %s1582_s19 }
 0x427   :  { %867 = vrot.lane.b32.xlu0 %v2155_v6, %s1581_s16  ;;  %843 = vrot.lane.b32.xlu1 %v784_v53, %s1582_s19 }
 0x42b   :  { %847 = vrot.lane.b32.xlu0 %v2155_v6, %s1582_s19  ;;  %819 = vrot.lane.b32.xlu1 %v2124_v14, %s1583_s20 }
 0x42f   :  { %825 = vrot.lane.b32.xlu0 %v785_v59, %s1583_s20  ;;  %823 = vrot.lane.b32.xlu1 %v784_v53, %s1583_s20 }
 0x433   :  { %869 = vrot.lane.b32.xlu0 %v2182_v24, %s1581_s16  ;;  %969 = vrot.lane.b32.xlu1 %v2155_v6, %s1576_s9 }
 0x437   :  { %829 = vrot.lane.b32.xlu0 %v2182_v24, %s1583_s20  ;;  %947 = vrot.lane.b32.xlu1 %v785_v59, %s1577_s12 }
 0x43b   :  { %986 = vrot.lane.b32.xlu0 %v783_v50, %s1584_s29  ;;  %927 = vrot.lane.b32.xlu1 %v785_v59, %s1578_s13 }
 0x43f   :  { %988 = vrot.lane.b32.xlu0 %v784_v53, %s1584_s29  ;;  %971 = vrot.lane.b32.xlu1 %v2182_v24, %s1576_s9 }
 0x443   :  { %907 = vrot.lane.b32.xlu1 %v785_v59, %s1579_s14 }
 0x447   :  { %951 = vrot.lane.b32.xlu1 %v2182_v24, %s1577_s12 }
 0x44b   :  { %883 = vrot.lane.b32.xlu1 %v785_v59, %s1580_s15 }
 0x44f   :  { %931 = vrot.lane.b32.xlu1 %v2182_v24, %s1578_s13 }
 0x453   :  { %865 = vrot.lane.b32.xlu1 %v785_v59, %s1581_s16 }
 0x457   :  { %911 = vrot.lane.b32.xlu1 %v2182_v24, %s1579_s14 }
 0x45b   :  { %845 = vrot.lane.b32.xlu1 %v785_v59, %s1582_s19 }
 0x45f   :  { %887 = vrot.lane.b32.xlu1 %v2182_v24, %s1580_s15 }
 0x463   :  { %827 = vrot.lane.b32.xlu1 %v2155_v6, %s1583_s20 }
 0x465   :  { %v2210_v10 = vpop.permute.xlu0 %921  ;;  %v2212_v26 = vpop.permute.xlu1 %961 }
 0x467   :  { %849 = vrot.lane.b32.xlu1 %v2182_v24, %s1582_s19 }
 0x469   :  { %v2216_v27 = vpop.permute.xlu0 %925  ;;  %v2218_v28 = vpop.permute.xlu1 %963 }
 0x46b   :  { %984 = vrot.lane.b32.xlu1 %v2124_v14, %s1584_s29 }
 0x46d   :  { %v2222_v29 = vpop.permute.xlu0 %903  ;;  %v966_v30 = vpop.permute.xlu1 %965 }
 0x46e   :  { %v976_v45 = vsel %vm216_vm0, %v2218_v28, %v966_v30 }
 0x46f   :  { %990 = vrot.lane.b32.xlu1 %v785_v59, %s1584_s29 }
 0x471   :  { %v2225_v31 = vpop.permute.xlu0 %877  ;;  %v942_v23 = vpop.permute.xlu1 %941 }
 0x472   :  { %1080 = vrot.lane.b32.xlu0 %v942_v23, %s1584_s29 }
 0x473   :  { %1094 = vrot.lane.b32.xlu1 %v2212_v26, %s1584_s29 }
 0x475   :  { %v2230_v33 = vpop.permute.xlu0 %881  ;;  %v2232_v32 = vpop.permute.xlu1 %943 }
 0x476   :  { %v955_v47 = vsel %vm195_vm1, %v942_v23, %v2232_v32 }
 0x477   :  { %1066 = vrot.lane.b32.xlu1 %v2210_v10, %s1584_s29 }
 0x479   :  { %v2236_v36 = vpop.permute.xlu0 %861  ;;  %v2238_v37 = vpop.permute.xlu1 %945 }
 0x47b   :  { %1038 = vrot.lane.b32.xlu1 %v2225_v31, %s1584_s29 }
 0x47d   :  { %v2242_v38 = vpop.permute.xlu0 %841  ;;  %v2244_v40 = vpop.permute.xlu1 %923 }
 0x47e   :  { %v936_v63 = vsel %vm174_vm2, %v2244_v40, %v2216_v27 }
 0x481   :  { %v822_v34 = vpop.permute.xlu0 %821  ;;  %v902_v42 = vpop.permute.xlu1 %901 }
 0x482   :  { %1052 = vrot.lane.b32.xlu0 %v902_v42, %s1584_s29  ;;  %v915_v9 = vsel %vm153_vm3, %v902_v42, %v2222_v29 }
 0x485   :  { %v968_v43 = vpop.permute.xlu0 %967  ;;  %v2247_v44 = vpop.permute.xlu1 %905 }
 0x486   :  { %1098 = vrot.lane.b32.xlu0 %v976_v45, %s1584_s29  ;;  %v977_v22 = vsel %vm216_vm0, %v966_v30, %v968_v43 }
 0x489   :  { %v950_v46 = vpop.permute.xlu0 %949  ;;  %v2252_v41 = vpop.permute.xlu1 %879 }
 0x48a   :  { %1082 = vrot.lane.b32.xlu0 %v955_v47, %s1584_s29  ;;  %v890_v12 = vsel %vm126_vm4, %v2252_v41, %v2230_v33 }
 0x48d   :  { %v2257_v49 = vpop.permute.xlu0 %929  ;;  %v860_v61 = vpop.permute.xlu1 %859 }
 0x48e   :  { %1070 = vrot.lane.b32.xlu0 %v936_v63, %s1584_s29  ;;  %v872_v15 = vsel %vm107_vm5, %v860_v61, %v2236_v36  ;;  %v871_v53 = vsel %vm107_vm5, %v2106_v48, %v860_v61 }
 0x491   :  { %v2263_v7 = vpop.permute.xlu0 %909  ;;  %v2265_v8 = vpop.permute.xlu1 %863 }
 0x492   :  { %1054 = vrot.lane.b32.xlu0 %v915_v9, %s1584_s29 }
 0x495   :  { %v2270_v11 = vpop.permute.xlu0 %885  ;;  %v2272_v2 = vpop.permute.xlu1 %839 }
 0x496   :  { %1042 = vrot.lane.b32.xlu0 %v890_v12, %s1584_s29 }
 0x499   :  { %v2278_v13 = vpop.permute.xlu0 %867  ;;  %v844_v3 = vpop.permute.xlu1 %843 }
 0x49a   :  { %1026 = vrot.lane.b32.xlu0 %v872_v15, %s1584_s29  ;;  %v853_v17 = vsel %vm86_vm6, %v2242_v38, %v844_v3 }
 0x49d   :  { %v2283_v14 = vpop.permute.xlu0 %847  ;;  %v820_v50 = vpop.permute.xlu1 %819 }
 0x49e   :  { %1024 = vrot.lane.b32.xlu0 %v871_v53, %s1584_s29  ;;  %v832_v20 = vsel %vm65_vm7, %v820_v50, %v822_v34  ;;  %v831_v23 = vsel %vm65_vm7, %v2110_v5, %v820_v50 }
 0x4a1   :  { %v2288_v0 = vpop.permute.xlu0 %825  ;;  %v824_v16 = vpop.permute.xlu1 %823 }
 0x4a2   :  { %v2293_v18 = vsel %vm65_vm7, %v822_v34, %v824_v16  ;;  %1014 = vrot.lane.b32.xlu0 %v853_v17, %s1584_s29 }
 0x4a5   :  { %v2297_v21 = vpop.permute.xlu0 %869  ;;  %v970_v59 = vpop.permute.xlu1 %969 }
 0x4a6   :  { %v2300_v48 = vsel %vm216_vm0, %v968_v43, %v970_v59  ;;  %998 = vrot.lane.b32.xlu0 %v832_v20, %s1584_s29 }
 0x4a9   :  { %v2304_v25 = vpop.permute.xlu0 %829  ;;  %v2306_v19 = vpop.permute.xlu1 %947 }
 0x4aa   :  { %1100 = vrot.lane.b32.xlu0 %v977_v22, %s1584_s29  ;;  %v958_v30 = vsel %vm195_vm1, %v2306_v19, %v950_v46 }
 0x4ad   :  { %v987_v34 = vpop.permute.xlu0 %986  ;;  %v928_v42 = vpop.permute.xlu1 %927 }
 0x4ae   :  { %v2313_v45 = vsel %vm174_vm2, %v928_v42, %v2257_v49  ;;  %996 = vrot.lane.b32.xlu0 %v831_v23, %s1584_s29  ;;  %v937_v5 = vsel %vm174_vm2, %v2216_v27, %v928_v42 }
 0x4b1   :  { %v2318_v43 = vpop.permute.xlu0 %988  ;;  %v2320_v47 = vpop.permute.xlu1 %971 }
 0x4b2   :  { %v2324_v61 = vsel %vm350_vm8, %v987_v34, %v2318_v43  ;;  %1088 = vrot.lane.b32.xlu0 %v958_v30, %s1584_s29  ;;  %v979_v12 = vsel %vm216_vm0, %v970_v59, %v2320_v47 }
 0x4b5   :  { %v908_v63 = vpop.permute.xlu1 %907 }
 0x4b6   :  { %v2331_v9 = vsel %vm153_vm3, %v908_v63, %v2263_v7  ;;  %1072 = vrot.lane.b32.xlu0 %v937_v5, %s1584_s29  ;;  %v917_v50 = vsel %vm153_vm3, %v2247_v44, %v908_v63 }
 0x4b9   :  { %v2336_v15 = vpop.permute.xlu1 %951 }
 0x4ba   :  { %1104 = vrot.lane.b32.xlu0 %v979_v12, %s1584_s29  ;;  %v959_v17 = vsel %vm195_vm1, %v950_v46, %v2336_v15 }
 0x4bd   :  { %v884_v53 = vpop.permute.xlu1 %883 }
 0x4be   :  { %v2343_v27 = vsel %vm126_vm4, %v884_v53, %v2270_v11  ;;  %1058 = vrot.lane.b32.xlu0 %v917_v50, %s1584_s29  ;;  %v891_v59 = vsel %vm126_vm4, %v2230_v33, %v884_v53 }
 0x4c1   :  { %v2348_v20 = vpop.permute.xlu1 %931 }
 0x4c2   :  { %1090 = vrot.lane.b32.xlu0 %v959_v17, %s1584_s29  ;;  %v939_v42 = vsel %vm174_vm2, %v2257_v49, %v2348_v20 }
 0x4c5   :  { %v866_v22 = vpop.permute.xlu1 %865 }
 0x4c6   :  { %v2355_v23 = vsel %vm107_vm5, %v866_v22, %v2278_v13  ;;  %1044 = vrot.lane.b32.xlu0 %v891_v59, %s1584_s29  ;;  %v874_v46 = vsel %vm107_vm5, %v2265_v8, %v866_v22  ;;  %v975_v22 = vsel %vm216_vm0, %v2212_v26, %v2218_v28  ;;  %v935_v28 = vsel %vm174_vm2, %v2210_v10, %v2244_v40 }
 0x4c7   :  { %v873_v10 = vsel %vm107_vm5, %v2236_v36, %v2265_v8  ;;  %v957_v36 = vsel %vm195_vm1, %v2238_v37, %v2306_v19  ;;  %v980_v40 = vsel %vm216_vm0, %v2320_v47, %v2112_v55  ;;  %v940_v55 = vsel %vm174_vm2, %v2348_v20, %v2116_v58 }
 0x4c9   :  { %v2361_v30 = vpop.permute.xlu1 %911 }
 0x4ca   :  { %1076 = vrot.lane.b32.xlu0 %v939_v42, %s1584_s29  ;;  %v919_v63 = vsel %vm153_vm3, %v2263_v7, %v2361_v30  ;;  %v876_v42 = vsel %vm107_vm5, %v2278_v13, %v2297_v21 }
 0x4cd   :  { %v846_v5 = vpop.permute.xlu1 %845 }
 0x4ce   :  { %v2368_v33 = vsel %vm86_vm6, %v846_v5, %v2283_v14  ;;  %1030 = vrot.lane.b32.xlu0 %v874_v46, %s1584_s29  ;;  %v854_v49 = vsel %vm86_vm6, %v844_v3, %v846_v5  ;;  %v834_v3 = vsel %vm65_vm7, %v824_v16, %v2288_v0 }
 0x4d1   :  { %v888_v12 = vpop.permute.xlu1 %887 }
 0x4d2   :  { %1062 = vrot.lane.b32.xlu0 %v919_v63, %s1584_s29  ;;  %1050 = vrot.lane.b32.xlu1 %v888_v12, %s1584_s29  ;;  %v893_v17 = vsel %vm126_vm4, %v2270_v11, %v888_v12 }
 0x4d5   :  { %v828_v50 = vpop.permute.xlu1 %827 }
 0x4d6   :  { %v835_v53 = vsel %vm65_vm7, %v2288_v0, %v828_v50  ;;  %1016 = vrot.lane.b32.xlu0 %v854_v49, %s1584_s29  ;;  %1036 = vrot.lane.b32.xlu1 %v2297_v21, %s1584_s29  ;;  %v956_v0 = vsel %vm195_vm1, %v2232_v32, %v2238_v37  ;;  %v836_v13 = vsel %vm65_vm7, %v828_v50, %v2304_v25 }
 0x4d7   :  { %v916_v32 = vsel %vm153_vm3, %v2222_v29, %v2247_v44  ;;  %v852_v29 = vsel %vm86_vm6, %v2272_v2, %v2242_v38  ;;  %v960_v37 = vsel %vm195_vm1, %v2336_v15, %v2114_v56  ;;  %v920_v56 = vsel %vm153_vm3, %v2361_v30, %v2118_v60 }
 0x4d9   :  { %v850_v7 = vpop.permute.xlu1 %849 }
 0x4da   :  { %1048 = vrot.lane.b32.xlu0 %v893_v17, %s1584_s29  ;;  %1022 = vrot.lane.b32.xlu1 %v850_v7, %s1584_s29  ;;  %v856_v26 = vsel %vm86_vm6, %v2283_v14, %v850_v7  ;;  %v889_v14 = vsel %vm126_vm4, %v2225_v31, %v2252_v41  ;;  %v851_v31 = vsel %vm86_vm6, %v2108_v54, %v2272_v2 }
 0x4dd   :  { %v2388_v59 = vpop.permute.xlu1 %984 }
 0x4de   :  { %1002 = vrot.lane.b32.xlu0 %v834_v3, %s1584_s29  ;;  %1096 = vrot.lane.b32.xlu1 %v975_v22, %s1584_s29  ;;  %v2397_v11 = vsel %vm350_vm8, %v2388_v59, %v987_v34 }
 0x4e2   :  { %1034 = vrot.lane.b32.xlu0 %v876_v42, %s1584_s29  ;;  %1084 = vrot.lane.b32.xlu1 %v956_v0, %s1584_s29 }
 0x4e6   :  { %1020 = vrot.lane.b32.xlu0 %v856_v26, %s1584_s29  ;;  %1068 = vrot.lane.b32.xlu1 %v935_v28, %s1584_s29 }
 0x4ea   :  { %1006 = vrot.lane.b32.xlu0 %v836_v13, %s1584_s29  ;;  %1056 = vrot.lane.b32.xlu1 %v916_v32, %s1584_s29 }
 0x4ee   :  { %992 = vrot.lane.b32.xlu0 %v2155_v6, %s1584_s29  ;;  %1040 = vrot.lane.b32.xlu1 %v889_v14, %s1584_s29  ;;  %v1081_v6 = vpop.permute.xlu0 %1080 }
 0x4f2   :  { %1028 = vrot.lane.b32.xlu1 %v873_v10, %s1584_s29 }
 0x4f4   :  { %v1053_v38 = vpop.permute.xlu0 %1052 }
 0x4f6   :  { %1012 = vrot.lane.b32.xlu1 %v852_v29, %s1584_s29 }
 0x4f8   :  { %v2449_v54 = vpop.permute.xlu0 %1098 }
 0x4fa   :  { %1010 = vrot.lane.b32.xlu1 %v851_v31, %s1584_s29 }
 0x4fc   :  { %v1083_v44 = vpop.permute.xlu0 %1082 }
 0x4fe   :  { %1000 = vrot.lane.b32.xlu1 %v2293_v18, %s1584_s29  ;;  %v2479_v18 = vpop.permute.xlu1 %990 }
 0x500   :  { %v2461_v41 = vpop.permute.xlu0 %1070 }
 0x502   :  { %1102 = vrot.lane.b32.xlu1 %v2300_v48, %s1584_s29  ;;  %v1095_v21 = vpop.permute.xlu1 %1094 }
 0x504   :  { %v1055_v8 = vpop.permute.xlu0 %1054 }
 0x505   :  { %v1138_v7 = vsel %vm350_vm8, %v1053_v38, %v1055_v8 }
 0x506   :  { %1086 = vrot.lane.b32.xlu1 %v957_v36, %s1584_s29  ;;  %v1067_v60 = vpop.permute.xlu1 %1066 }
 0x508   :  { %v2471_v2 = vpop.permute.xlu0 %1042 }
 0x50a   :  { %1074 = vrot.lane.b32.xlu1 %v2313_v45, %s1584_s29  ;;  %v1039_v34 = vpop.permute.xlu1 %1038 }
 0x50c   :  { %v1027_v16 = vpop.permute.xlu0 %1026 }
 0x50e   :  { %1106 = vrot.lane.b32.xlu1 %v980_v40, %s1584_s29 }
 0x510   :  { %v1025_v58 = vpop.permute.xlu0 %1024 }
 0x511   :  { %v1126_v32 = vsel %vm350_vm8, %v1025_v58, %v1027_v16 }
 0x512   :  { %1060 = vrot.lane.b32.xlu1 %v2331_v9, %s1584_s29 }
 0x514   :  { %v2484_v48 = vpop.permute.xlu0 %1014 }
 0x516   :  { %1092 = vrot.lane.b32.xlu1 %v960_v37, %s1584_s29  ;;  %v2530_v37 = vld [vmem:[%s2703_s2] sm:$0xff] }
 0x518   :  { %v999_v19 = vpop.permute.xlu0 %998 }
 0x51a   :  { %1046 = vrot.lane.b32.xlu1 %v2343_v27, %s1584_s29 }
 0x51c   :  { %v1101_v45 = vpop.permute.xlu0 %1100 }
 0x51e   :  { %1078 = vrot.lane.b32.xlu1 %v940_v55, %s1584_s29  ;;  %v1108_v55 = vsel %vm350_vm8, %v2098_v35, %v2388_v59 }
 0x520   :  { %v997_v9 = vpop.permute.xlu0 %996 }
 0x522   :  { %1032 = vrot.lane.b32.xlu1 %v2355_v23, %s1584_s29 }
 0x524   :  { %v2494_v20 = vpop.permute.xlu0 %1088 }
 0x526   :  { %1064 = vrot.lane.b32.xlu1 %v920_v56, %s1584_s29 }
 0x52a   :  { %1018 = vrot.lane.b32.xlu1 %v2368_v33, %s1584_s29  ;;  %v1150_v33 = vsel %vm350_vm8, %v1081_v6, %v1083_v44 }
 0x52e   :  { %1004 = vrot.lane.b32.xlu1 %v835_v53, %s1584_s29 }
 0x532   :  { %1008 = vrot.lane.b32.xlu1 %v2304_v25, %s1584_s29 }
 0x536   :  { %994 = vrot.lane.b32.xlu1 %v2182_v24, %s1584_s29  ;;  %v2499_v24 = vpop.permute.xlu0 %1072 }
 0x53a   :  { %v1105_v12 = vpop.permute.xlu0 %1104 }
 0x53e   :  { %v1059_v3 = vpop.permute.xlu0 %1058 }
 0x542   :  { %v1091_v28 = vpop.permute.xlu0 %1090 }
 0x544   :  { %v2488_v47 = vpop.permute.xlu1 %1050 }
 0x546   :  { %v1045_v29 = vpop.permute.xlu0 %1044 }
 0x548   :  { %v2490_v15 = vpop.permute.xlu1 %1036 }
 0x54a   :  { %v1077_v38 = vpop.permute.xlu0 %1076 }
 0x54c   :  { %v2492_v27 = vpop.permute.xlu1 %1022 }
 0x54e   :  { %v1031_v58 = vpop.permute.xlu0 %1030 }
 0x550   :  { %v1097_v25 = vpop.permute.xlu1 %1096 }
 0x551   :  { %v1156_v23 = vsel %vm350_vm8, %v1095_v21, %v1097_v25  ;;  %v1157_v30 = vsel %vm350_vm8, %v1097_v25, %v2449_v54 }
 0x552   :  { %1233 = vmatprep.subr.mxu1 %v1157_v30 }
 0x553   :  { %1234 = vmatpush1.msra.mxu1 %v1156_v23 }
 0x554   :  { %v1085_v46 = vpop.permute.xlu1 %1084 }
 0x555   :  { %v1151_v5 = vsel %vm350_vm8, %v1083_v44, %v1085_v46  ;;  %v1114_v44 = vsel %vm350_vm8, %v997_v9, %v999_v19 }
 0x556   :  { %1235 = vmatprep.subr.mxu1 %v1151_v5  ;;  %v1154_v5 = vsel %vm350_vm8, %v2494_v20, %v1091_v28 }
 0x557   :  { %1236 = vmatpush1.msra.mxu1 %v1150_v33 }
 0x558   :  { %v1069_v63 = vpop.permute.xlu1 %1068 }
 0x559   :  { %v1144_v49 = vsel %vm350_vm8, %v1067_v60, %v1069_v63  ;;  %v1145_v50 = vsel %vm350_vm8, %v1069_v63, %v2461_v41  ;;  %v1063_v60 = vpop.permute.xlu0 %1062 }
 0x55a   :  { %1237 = vmatprep.subr.mxu1 %v1145_v50 }
 0x55b   :  { %1238 = vmatpush1.msra.mxu1 %v1144_v49 }
 0x55c   :  { %v2506_v53 = vpop.permute.xlu1 %1056 }
 0x55d   :  { %v1139_v17 = vsel %vm350_vm8, %v1055_v8, %v2506_v53  ;;  %v1017_v9 = vpop.permute.xlu0 %1016  ;;  %v1140_v30 = vsel %vm350_vm8, %v2506_v53, %v1059_v3 }
 0x55e   :  { %1239 = vmatprep.subr.mxu1 %v1139_v17 }
 0x55f   :  { %1240 = vmatpush1.msra.mxu1 %v1138_v7 }
 0x560   :  { %v1041_v22 = vpop.permute.xlu1 %1040 }
 0x561   :  { %v1132_v42 = vsel %vm350_vm8, %v1039_v34, %v1041_v22  ;;  %v1133_v0 = vsel %vm350_vm8, %v1041_v22, %v2471_v2 }
 0x562   :  { %1241 = vmatprep.subr.mxu1 %v1133_v0 }
 0x563   :  { %1242 = vmatpush1.msra.mxu1 %v1132_v42 }
 0x564   :  { %v2514_v26 = vpop.permute.xlu1 %1028 }
 0x565   :  { %v1127_v13 = vsel %vm350_vm8, %v1027_v16, %v2514_v26  ;;  %v1158_v16 = vsel %vm350_vm8, %v2449_v54, %v1101_v45  ;;  %v1128_v22 = vsel %vm350_vm8, %v2514_v26, %v1031_v58 }
 0x566   :  { %1243 = vmatprep.subr.mxu1 %v1127_v13 }
 0x567   :  { %1244 = vmatpush1.msra.mxu1 %v1126_v32 }
 0x568   :  { %v1013_v14 = vpop.permute.xlu1 %1012 }
 0x569   :  { %v1121_v10 = vsel %vm350_vm8, %v1013_v14, %v2484_v48 }
 0x56a   :  { %1245 = vmatprep.subr.mxu1 %v1121_v10 }
 0x56c   :  { %v1011_v31 = vpop.permute.xlu1 %1010 }
 0x56d   :  { %v1120_v6 = vsel %vm350_vm8, %v1011_v31, %v1013_v14 }
 0x56e   :  { %1246 = vmatpush1.msra.mxu1 %v1120_v6 }
 0x570   :  { %v2522_v36 = vpop.permute.xlu1 %1000 }
 0x571   :  { %v1115_v40 = vsel %vm350_vm8, %v999_v19, %v2522_v36  ;;  %v1146_v19 = vsel %vm350_vm8, %v2461_v41, %v2499_v24  ;;  %v1049_v41 = vpop.permute.xlu0 %1048 }
 0x572   :  { %1247 = vmatprep.subr.mxu1 %v1115_v40  ;;  %v1137_v13 = vsel %vm350_vm8, %v1049_v41, %v2488_v47 }
 0x573   :  { %1248 = vmatpush1.msra.mxu1 %v1114_v44  ;;  %v1111_v44 = vsel %vm350_vm8, %v2318_v43, %v2479_v18 }
 0x574   :  { %1249 = vmatprep.subr.mxu1 %v2397_v11  ;;  %v1103_v8 = vpop.permute.xlu1 %1102 }
 0x575   :  { %1250 = vmatpush1.msra.mxu1 %v1108_v55  ;;  %v1159_v56 = vsel %vm350_vm8, %v1101_v45, %v1103_v8  ;;  %v1160_v45 = vsel %vm350_vm8, %v1103_v8, %v1105_v12  ;;  %v1003_v49 = vpop.permute.xlu0 %1002 }
 0x576   :  { %1304 = vmatprep.subr.mxu0 %v1159_v56  ;;  %1556 = vmatmul.mubr.msk.f32.vlgmr.msra.gmra.mxu1 %vm459_vm9, %v2530_v37 }
 0x577   :  { %1305 = vmatpush1.msra.mxu0 %v1158_v16  ;;  %1425 = vmatprep.mubr.f32.mxu1 %v1585_v62 }
 0x578   :  { %v1087_v21 = vpop.permute.xlu1 %1086 }
 0x579   :  { %v1152_v35 = vsel %vm350_vm8, %v1085_v46, %v1087_v21  ;;  %v1153_v59 = vsel %vm350_vm8, %v1087_v21, %v2494_v20  ;;  %v1035_v20 = vpop.permute.xlu0 %1034 }
 0x57a   :  { %1306 = vmatprep.subr.mxu0 %v1153_v59  ;;  %v1131_v10 = vsel %vm350_vm8, %v1035_v20, %v2490_v15 }
 0x57b   :  { %1307 = vmatpush1.msra.mxu0 %v1152_v35 }
 0x57c   :  { %v1075_v11 = vpop.permute.xlu1 %1074 }
 0x57d   :  { %v1147_v54 = vsel %vm350_vm8, %v2499_v24, %v1075_v11  ;;  %v1148_v17 = vsel %vm350_vm8, %v1075_v11, %v1077_v38 }
 0x57e   :  { %1308 = vmatprep.subr.mxu0 %v1147_v54 }
 0x57f   :  { %1309 = vmatpush1.msra.mxu0 %v1146_v19 }
 0x580   :  { %v1107_v62 = vpop.permute.xlu1 %1106 }
 0x581   :  { %v1161_v34 = vsel %vm350_vm8, %v1105_v12, %v1107_v62  ;;  %v1134_v12 = vsel %vm350_vm8, %v2471_v2, %v1045_v29 }
 0x582   :  { %1375 = vmatprep.subr.mxu1 %v1161_v34 }
 0x583   :  { %1376 = vmatpush1.msra.mxu1 %v1160_v45 }
 0x584   :  { %v1061_v25 = vpop.permute.xlu1 %1060 }
 0x585   :  { %v1141_v23 = vsel %vm350_vm8, %v1059_v3, %v1061_v25  ;;  %v1142_v0 = vsel %vm350_vm8, %v1061_v25, %v1063_v60 }
 0x586   :  { %1310 = vmatprep.subr.mxu0 %v1141_v23 }
 0x587   :  { %1311 = vmatpush1.msra.mxu0 %v1140_v30 }
 0x588   :  { %v1093_v46 = vpop.permute.xlu1 %1092 }
 0x589   :  { %v1155_v24 = vsel %vm350_vm8, %v1091_v28, %v1093_v46  ;;  %v1021_v28 = vpop.permute.xlu0 %1020 }
 0x58a   :  { %1377 = vmatprep.subr.mxu1 %v1155_v24  ;;  %v1125_v47 = vsel %vm350_vm8, %v1021_v28, %v2492_v27 }
 0x58b   :  { %1378 = vmatpush1.msra.mxu1 %v1154_v5 }
 0x58c   :  { %v1047_v33 = vpop.permute.xlu1 %1046 }
 0x58d   :  { %v1135_v63 = vsel %vm350_vm8, %v1045_v29, %v1047_v33  ;;  %v1136_v32 = vsel %vm350_vm8, %v1047_v33, %v1049_v41  ;;  %v1122_v29 = vsel %vm350_vm8, %v2484_v48, %v1017_v9  ;;  %v1007_v40 = vpop.permute.xlu0 %1006  ;;  %v1116_v48 = vsel %vm350_vm8, %v2522_v36, %v1003_v49 }
 0x58e   :  { %1312 = vmatprep.subr.mxu0 %v1135_v63 }
 0x58f   :  { %1313 = vmatpush1.msra.mxu0 %v1134_v12 }
 0x590   :  { %v1079_v50 = vpop.permute.xlu1 %1078 }
 0x591   :  { %v1149_v53 = vsel %vm350_vm8, %v1077_v38, %v1079_v50  ;;  %v993_v56 = vpop.permute.xlu0 %992 }
 0x592   :  { %1379 = vmatprep.subr.mxu1 %v1149_v53  ;;  %v1112_v43 = vsel %vm350_vm8, %v2479_v18, %v993_v56 }
 0x593   :  { %1380 = vmatpush1.msra.mxu1 %v1148_v17 }
 0x594   :  { %v1033_v7 = vpop.permute.xlu1 %1032 }
 0x595   :  { %v1129_v3 = vsel %vm350_vm8, %v1031_v58, %v1033_v7  ;;  %v1130_v31 = vsel %vm350_vm8, %v1033_v7, %v1035_v20 }
 0x596   :  { %1314 = vmatprep.subr.mxu0 %v1129_v3 }
 0x597   :  { %1315 = vmatpush1.msra.mxu0 %v1128_v22 }
 0x598   :  { %v1065_v2 = vpop.permute.xlu1 %1064 }
 0x599   :  { %v1143_v42 = vsel %vm350_vm8, %v1063_v60, %v1065_v2 }
 0x59a   :  { %1381 = vmatprep.subr.mxu1 %v1143_v42 }
 0x59b   :  { %1382 = vmatpush1.msra.mxu1 %v1142_v0 }
 0x59c   :  { %1383 = vmatprep.subr.mxu1 %v1137_v13  ;;  %v1019_v14 = vpop.permute.xlu1 %1018 }
 0x59d   :  { %1384 = vmatpush1.msra.mxu1 %v1136_v32  ;;  %v1123_v26 = vsel %vm350_vm8, %v1017_v9, %v1019_v14  ;;  %v1124_v6 = vsel %vm350_vm8, %v1019_v14, %v1021_v28 }
 0x59e   :  { %1316 = vmatprep.subr.mxu0 %v1123_v26  ;;  %1385 = vmatprep.subr.mxu1 %v1131_v10 }
 0x59f   :  { %1317 = vmatpush1.msra.mxu0 %v1122_v29  ;;  %1386 = vmatpush1.msra.mxu1 %v1130_v31  ;;  %v1508_v29 = vld [vmem:[%s2698_s0 + $0x10] sm:$0xf]  ;;  %v1509_v31 = vld [vmem:[%s2698_s0 + $0x18] sm:$0xf] }
 0x5a0   :  { %1387 = vmatprep.subr.mxu1 %v1125_v47  ;;  %v1005_v38 = vpop.permute.xlu1 %1004  ;;  %1514 = vst [vmem:[%s2706_s8 + $0x8] sm:$0xf] %v1508_v29  ;;  %1515 = vst [vmem:[%s2706_s8 + $0x10] sm:$0xf] %v1509_v31 }
 0x5a1   :  { %1388 = vmatpush1.msra.mxu1 %v1124_v6  ;;  %v1117_v15 = vsel %vm350_vm8, %v1003_v49, %v1005_v38  ;;  %v1118_v8 = vsel %vm350_vm8, %v1005_v38, %v1007_v40  ;;  %v1510_v6 = vld [vmem:[%s2698_s0 + $0x20] sm:$0xf]  ;;  %v1511_v38 = vld [vmem:[%s2698_s0 + $0x28] sm:$0xf] }
 0x5a2   :  { %1318 = vmatprep.subr.mxu0 %v1117_v15  ;;  %v1476_v15 = vld [vmem:[%s2705_s6] sm:$0xff]  ;;  %1516 = vst [vmem:[%s2706_s8 + $0x18] sm:$0xf] %v1510_v6  ;;  %1517 = vst [vmem:[%s2706_s8 + $0x20] sm:$0xf] %v1511_v38 }
 0x5a3   :  { %1319 = vmatpush1.msra.mxu0 %v1116_v48 }
 0x5a4   :  { %1320 = vmatprep.subr.mxu0 %v1111_v44  ;;  %v1009_v55 = vpop.permute.xlu1 %1008 }
 0x5a5   :  { %1321 = vmatpush1.msra.mxu0 %v2324_v61  ;;  %v1119_v27 = vsel %vm350_vm8, %v1007_v40, %v1009_v55  ;;  %v1512_v40 = vld [vmem:[%s2698_s0 + $0x30] sm:$0xf] }
 0x5a6   :  { %1557 = vmatmul.mubr.msk.f32.vlgmr.msra.gmra.mxu0 %vm459_vm9, %v2530_v37  ;;  %1389 = vmatprep.subr.mxu1 %v1119_v27  ;;  %1518 = vst [vmem:[%s2706_s8 + $0x28] sm:$0xf] %v1512_v40 }
 0x5a7   :  { %1390 = vmatpush1.msra.mxu1 %v1118_v8 }
 0x5a8   :  { %v995_v36 = vpop.permute.xlu1 %994 }
 0x5a9   :  { %v1113_v16 = vsel %vm350_vm8, %v993_v56, %v995_v36 }
 0x5aa   :  { %1391 = vmatprep.subr.mxu1 %v1113_v16 }
 0x5ab   :  { %1392 = vmatpush1.msra.mxu1 %v1112_v43 }
 0x5ac   :  { %1558 = vmatmul.mubr.msk.f32.vlgmr.msra.gmra.mxu1 %vm459_vm9, %v2530_v37 }
 0x636   :  { %v2596_v61 = vpop.f32.mrf.mxu1 }
 0x637   :  { %v1432_v21 = vmul.f32 %v2596_v61, %v2038_v51 }
 0x638   :  { %v2598_v58 = vpop.f32.mrf.mxu1 }
 0x639   :  { %v1433_v35 = vmul.f32 %v2598_v58, %v2040_v52 }
 0x63b   :  { %v1438_v11 = vadd.f32 %v1433_v35, %v1432_v21 }
 0x666   :  { %v2604_v59 = vpop.f32.mrf.mxu0 }
 0x667   :  { %v1434_v18 = vmul.f32 %v2604_v59, %v2044_v39 }
 0x668   :  { %v2608_v60 = vpop.f32.mrf.mxu0 }
 0x669   :  { %v1439_v54 = vadd.f32 %v1438_v11, %v1434_v18  ;;  %v1435_v37 = vmul.f32 %v2608_v60, %v2054_v57 }
 0x66b   :  { %v1440_v62 = vadd.f32 %v1439_v54, %v1435_v37 }
 0x66c   :  { %v2612_v19 = vpop.f32.mrf.mxu1 }
 0x66d   :  { %v1436_v34 = vmul.f32 %v2612_v19, %v2060_v1 }
 0x66e   :  { %v2616_v45 = vpop.f32.mrf.mxu1 }
 0x66f   :  { %v1441_v9 = vadd.f32 %v1440_v62, %v1436_v34  ;;  %v1437_v25 = vmul.f32 %v2616_v45, %v2062_v4 }
 0x671   :  { %v1442_v23 = vadd.f32 %v1441_v9, %v1437_v25 }
 0x673   :  { %1443 = vadd.xlane.f32.xlu0 %v1442_v23 }
 0x6fc   :  { %v1444_v30 = vpop.xlane.xlu0 %1443 }
 0x6fd   :  { %v1445_v46 = vmul.f32 0.001953125, %v1444_v30 }
 0x6ff   :  { %v1446_v41 = vsub.f32 %v2596_v61, %v1445_v46  ;;  %v1447_v24 = vsub.f32 %v2598_v58, %v1445_v46  ;;  %v1448_v5 = vsub.f32 %v2604_v59, %v1445_v46  ;;  %v1449_v33 = vsub.f32 %v2608_v60, %v1445_v46 }
 0x700   :  { %v1450_v63 = vsub.f32 %v2612_v19, %v1445_v46  ;;  %v1451_v53 = vsub.f32 %v2616_v45, %v1445_v46 }
 0x701   :  { %v1452_v12 = vmul.f32 %v1446_v41, %v2038_v51  ;;  %v1453_v49 = vmul.f32 %v1447_v24, %v2040_v52  ;;  %v1454_v50 = vmul.f32 %v1448_v5, %v2044_v39  ;;  %v1455_v17 = vmul.f32 %v1449_v33, %v2054_v57  ;;  %v1472_v57 = vld [vmem:[%s2704_s5] sm:$0xff] }
 0x702   :  { %v1456_v3 = vmul.f32 %v1450_v63, %v2060_v1  ;;  %v1457_v42 = vmul.f32 %v1451_v53, %v2062_v4  ;;  %v1507_v4 = vld [vmem:[%s2698_s0 + $0x8] sm:$0xf] }
 0x703   :  { %v1458_v7 = vmul.f32 %v1452_v12, %v1452_v12  ;;  %v1459_v20 = vmul.f32 %v1453_v49, %v1453_v49  ;;  %v1460_v22 = vmul.f32 %v1454_v50, %v1454_v50  ;;  %v1461_v0 = vmul.f32 %v1455_v17, %v1455_v17  ;;  %1513 = vst [vmem:[%s2706_s8] sm:$0xf] %v1507_v4 }
 0x704   :  { %v1462_v13 = vmul.f32 %v1456_v3, %v1456_v3  ;;  %v1463_v32 = vmul.f32 %v1457_v42, %v1457_v42 }
 0x705   :  { %v1464_v2 = vadd.f32 %v1459_v20, %v1458_v7 }
 0x707   :  { %v1465_v28 = vadd.f32 %v1464_v2, %v1460_v22 }
 0x709   :  { %v1466_v51 = vadd.f32 %v1465_v28, %v1461_v0 }
 0x70b   :  { %v1467_v52 = vadd.f32 %v1466_v51, %v1462_v13 }
 0x70d   :  { %v1468_v14 = vadd.f32 %v1467_v52, %v1463_v32 }
 0x70f   :  { %1469 = vadd.xlane.f32.xlu1 %v1468_v14 }
 0x798   :  { %v1470_v39 = vpop.xlane.xlu1 %1469 }
 0x799   :  { %v1471_v26 = vmul.f32 0.001953125, %v1470_v39 }
 0x79b   :  { %v1473_v10 = vadd.f32 1e-05, %v1471_v26 }
 0x79d   :  { %1574 = vrsqrt.f32 %v1473_v10 }
 0x7aa   :  { %v1575_v1 = vpop.eup %1574 }
 0x7ab   :  { %v1475_v47 = vmul.f32 %v1575_v1, %v1472_v57 }
 0x7ad   :  { %1481 = vperm.xlu0 %1570, %v1475_v47   ;;  %v1477_v48 = vmul.f32 %v1475_v47, %v1445_v46 }
 0x7af   :  { %v1478_v44 = vsub.f32 %v1476_v15, %v1477_v48 }
 0x7b1   :  { %1492 = vperm.xlu1 %1571, %v1478_v44  }
 0x828   :  { %v1482_v55 = vpop.permute.xlu0 %1481 }
 0x829   :  { %v1484_v27 = vmul.f32 %v1482_v55, %v2596_v61  ;;  %v1485_v8 = vmul.f32 %v1482_v55, %v2598_v58  ;;  %v1486_v56 = vmul.f32 %v1482_v55, %v2604_v59  ;;  %v1487_v36 = vmul.f32 %v1482_v55, %v2608_v60 }
 0x82a   :  { %v1488_v16 = vmul.f32 %v1482_v55, %v2612_v19  ;;  %v1489_v43 = vmul.f32 %v1482_v55, %v2616_v45 }
 0x82c   :  { %v1493_v21 = vpop.permute.xlu1 %1492 }
 0x82d   :  { %v1495_v35 = vadd.f32 %v1493_v21, %v1484_v27  ;;  %v1496_v11 = vadd.f32 %v1493_v21, %v1485_v8  ;;  %v1497_v18 = vadd.f32 %v1493_v21, %v1486_v56  ;;  %v1498_v54 = vadd.f32 %v1493_v21, %v1487_v36 }
 0x82e   :  { %v1499_v37 = vadd.f32 %v1493_v21, %v1488_v16  ;;  %v1500_v62 = vadd.f32 %v1493_v21, %v1489_v43 }
 0x82f   :  { %v1501_v34 = vmax.f32 %v1495_v35, 0.0  ;;  %v1502_v9 = vmax.f32 %v1496_v11, 0.0  ;;  %v1503_v61 = vmax.f32 %v1497_v18, 0.0  ;;  %v1504_v25 = vmax.f32 %v1498_v54, 0.0 }
 0x830   :  { %v1505_v58 = vmax.f32 %v1499_v37, 0.0  ;;  %v1506_v23 = vmax.f32 %v1500_v62, 0.0 }
 0x831   :  { %v1525_v59 = vrot.slane %v1501_v34, 4  ;;  %v1526_v30 = vrot.slane %v1502_v9, 4  ;;  %v1527_v60 = vrot.slane %v1503_v61, 4  ;;  %v1528_v46 = vrot.slane %v1504_v25, 4 }
 0x832   :  { %v1529_v19 = vrot.slane %v1505_v58, 4  ;;  %v1530_v41 = vrot.slane %v1506_v23, 4 }
 0x833   :  { %1537 = vst [vmem:[%s2706_s8 + $0x30] ss:$-44 sps:$4 sm:$0xff] %v1525_v59   ;;  %1538 = vst [vmem:[%s2706_s8 + $0x38] ss:$-44 sps:$4 sm:$0xff] %v1526_v30  }
 0x834   :  { %1539 = vst [vmem:[%s2706_s8 + $0x40] ss:$-44 sps:$4 sm:$0xff] %v1527_v60   ;;  %1540 = vst [vmem:[%s2706_s8 + $0x48] ss:$-44 sps:$4 sm:$0xff] %v1528_v46  }
 0x835   :  { %1541 = vst [vmem:[%s2706_s8 + $0x50] ss:$-44 sps:$4 sm:$0xff] %v1529_v19   ;;  %1542 = vst [vmem:[%s2706_s8 + $0x58] ss:$-44 sps:$4 sm:$0xff] %v1530_v41  }

</bundles_post_ra>
